<compile_context>
chip_gen: v7x
topology: tpu7x:2x2x1
jax: 0.10.0
libtpu: 0.0.40
codegen_flags: <defaults>
</compile_context>

<pallas_src>
import functools

import jax
import jax.numpy as jnp
from jax.experimental import pallas as pl
from jax.experimental.pallas import tpu as pltpu


# ------------------------ fused upsample+conv kernel -------------------------

def _upsample_conv_kernel(x_ref, w_ref, b_ref, o_ref, *, thi, W, Cin, Cout):
    """One (batch n, row-tile i) grid step of fused nearest-2x-upsample + 3x3 conv.

    x_ref: (1, H+2, W+2, Cin)        zero-padded input image (resident across i)
    w_ref: (9*Cin, 4*Cout) bf16      phase-packed folded weights, K=(r,c,ci), N=(py,px,co)
    b_ref: (1, 4*Cout) f32           bias tiled over the 4 output phases
    o_ref: (1, thi, 2, W, 2*Cout)    output row tile, phase-explicit lane-dense layout
    """
    i = pl.program_id(1)
    r0 = pl.multiple_of(i * thi, thi)

    # Input rows needed by this output tile (thi + 2 padded rows); cast to bf16 once.
    xw = x_ref[0, pl.ds(r0, thi + 2), :, :].astype(jnp.bfloat16)     # (thi+2, W+2, Cin)

    # Three column-shifted slabs (only misaligned sublane slices; shared by all taps).
    xc = [xw[:, c:c + W, :] for c in range(3)]                       # (thi+2, W, Cin)

    # Single 9-tap im2col, K order (row offset, col offset, channel).
    cat = jnp.concatenate(
        [xc[c][r:r + thi].reshape(thi * W, Cin) for r in range(3) for c in range(3)],
        axis=-1)                                                     # (thi*W, 9*Cin) bf16

    # One deep bf16 matmul covering all four output phases; f32 accumulation.
    acc = jnp.dot(cat, w_ref[...], preferred_element_type=jnp.float32)   # (thi*W, 4*Cout)
    acc = acc + b_ref[...]                                            # single f32 bias add

    # Row-phase slabs are contiguous 2*Cout-wide (128-lane for Cout=64) column slices;
    # store each directly -- no interleave epilogue, unmasked lane-dense stores.
    half = 2 * Cout
    out0 = acc[:, :half].astype(o_ref.dtype).reshape(thi, W, half)    # py = 0
    out1 = acc[:, half:].astype(o_ref.dtype).reshape(thi, W, half)    # py = 1
    o_ref[0, :, 0, :, :] = out0
    o_ref[0, :, 1, :, :] = out1


# ----------------------- weight folding (done once, XLA) ---------------------

def _fold_upsample_into_conv(w_oihw):
    """Fold nearest-2x upsampling into the 3x3 conv and phase-pack the result.

    Returns (9*Cin, 4*Cout): K index = (r*3 + c)*Cin + ci over the 1-pixel-padded
    ORIGINAL grid, N index = (2*py + px)*Cout + co (row-phase major, so each row
    phase is a contiguous 2*Cout-wide column slab of the matmul result).
    """
    Cout, Cin = w_oihw.shape[0], w_oihw.shape[1]
    # B[p, r, k] == 1 iff original tap k (along one spatial axis) contributes to
    # padded-grid offset r for output phase p (derived from nearest-2x + pad 1).
    B = jnp.array([[[1.0, 0.0, 0.0],
                    [0.0, 1.0, 1.0],
                    [0.0, 0.0, 0.0]],
                   [[0.0, 0.0, 0.0],
                    [1.0, 1.0, 0.0],
                    [0.0, 0.0, 1.0]]], dtype=jnp.float32)
    weff = jnp.einsum('prk,qcl,oikl->rcipqo', B, B, w_oihw.astype(jnp.float32))
    return weff.reshape(9 * Cin, 4 * Cout)


# --------------------------- VMEM budget helpers ------------------------------

def _vmem_capacity_bytes():
    try:
        return int(pltpu.get_tpu_info().vmem_capacity_bytes)
    except Exception:
        return 64 * 1024 * 1024      # conservative (v7x-sized) fallback


def _estimate_vmem_bytes(thi, H, W, Cin, Cout, x_itemsize):
    M = thi * W
    return (M * 9 * Cin * 2                              # bf16 im2col LHS
            + M * 4 * Cout * 4                           # f32 MXU accumulator
            + 2 * M * 4 * Cout * x_itemsize              # double-buffered output block
            + 2 * 9 * Cin * 4 * Cout * 2                 # packed bf16 weights
            + 2 * (H + 2) * (W + 2) * Cin * x_itemsize)  # resident padded image


def _pick_row_tile(H, W, Cin, Cout, x_itemsize, budget):
    """Largest divisor of H whose working set fits the VMEM budget."""
    best = 1
    for thi in range(1, H + 1):
        if H % thi:
            continue
        if _estimate_vmem_bytes(thi, H, W, Cin, Cout, x_itemsize) <= budget:
            best = thi
    return best


# --------------------------------- wrappers -----------------------------------

def upsample_forward_nhwc(x_nhwc, conv_w, conv_b, *, row_tile=None):
    """Transpose-free forward pass (NHWC in, NHWC out). Preferred entry point."""
    N, H, W, Cin = x_nhwc.shape
    Cout = conv_w.shape[0]
    assert conv_w.shape == (Cout, Cin, 3, 3)

    cap = _vmem_capacity_bytes()
    x_itemsize = jnp.dtype(x_nhwc.dtype).itemsize
    if row_tile is None:
        row_tile = _pick_row_tile(H, W, Cin, Cout, x_itemsize, budget=cap // 2)
    thi = row_tile
    assert H % thi == 0

    est = _estimate_vmem_bytes(thi, H, W, Cin, Cout, x_itemsize)
    vmem_limit = int(min(max(32 << 20, est + (est >> 1) + (4 << 20)), (cap // 4) * 3))

    # Zero-pad H/W by 1: the conv padding on the upsampled grid maps exactly onto a
    # 1-pixel pad of the original grid.
    x_pad = jnp.pad(x_nhwc, ((0, 0), (1, 1), (1, 1), (0, 0)))

    w_packed = _fold_upsample_into_conv(conv_w).astype(jnp.bfloat16)   # (9*Cin, 4*Cout)
    b4 = jnp.tile(conv_b.astype(jnp.float32), 4).reshape(1, 4 * Cout)

    kern = functools.partial(_upsample_conv_kernel, thi=thi, W=W, Cin=Cin, Cout=Cout)
    out5 = pl.pallas_call(
        kern,
        out_shape=jax.ShapeDtypeStruct((N, H, 2, W, 2 * Cout), x_nhwc.dtype),
        grid=(N, H // thi),
        in_specs=[
            # Full padded image; block index independent of i -> resident across row tiles.
            pl.BlockSpec((1, H + 2, W + 2, Cin), lambda n, i: (n, 0, 0, 0)),
            pl.BlockSpec((9 * Cin, 4 * Cout), lambda n, i: (0, 0)),    # resident weights
            pl.BlockSpec((1, 4 * Cout), lambda n, i: (0, 0)),          # bias
        ],
        out_specs=pl.BlockSpec((1, thi, 2, W, 2 * Cout), lambda n, i: (n, i, 0, 0, 0)),
        compiler_params=pltpu.CompilerParams(
            dimension_semantics=("parallel", "parallel"),
            vmem_limit_bytes=vmem_limit,
        ),
    )(x_pad, w_packed, b4)

    # (N, H, 2, W, 2*Cout) -> (N, 2H, 2W, Cout) is a contiguous (free) reshape.
    return out5.reshape(N, 2 * H, 2 * W, Cout)


def upsample_forward(x_nchw, conv_w, conv_b, *, row_tile=None):
    """NCHW boundary for parity with the PyTorch module.

    The two transposes below are the only extra HBM traffic; models that keep NHWC
    activations should call `upsample_forward_nhwc` directly (fully transpose-free).
    """
    x_nhwc = jnp.transpose(x_nchw, (0, 2, 3, 1))
    out_nhwc = upsample_forward_nhwc(x_nhwc, conv_w, conv_b, row_tile=row_tile)
    return jnp.transpose(out_nhwc, (0, 3, 1, 2))


# ----------------------------------- main ------------------------------------

if __name__ == "__main__":
    N, C, H, W = 2, 64, 16, 16
    key = jax.random.PRNGKey(0)
    kx, kw, kb = jax.random.split(key, 3)
    x = jax.random.normal(kx, (N, C, H, W), dtype=jnp.float32)
    conv_w = 0.05 * jax.random.normal(kw, (C, C, 3, 3), dtype=jnp.float32)
    conv_b = 0.05 * jax.random.normal(kb, (C,), dtype=jnp.float32)

    # Reference: nearest 2x upsample + XLA conv (same semantics as the PyTorch module).
    up = jnp.repeat(jnp.repeat(x, 2, axis=2), 2, axis=3)
    ref = jax.lax.conv_general_dilated(
        up, conv_w, window_strides=(1, 1), padding=((1, 1), (1, 1)),
        dimension_numbers=("NCHW", "OIHW", "NCHW"),
        precision=jax.lax.Precision.HIGHEST) + conv_b[None, :, None, None]

    # 1) PyTorch-parity NCHW entry point, default (budgeted) row tile.
    fwd = jax.jit(upsample_forward)
    out = fwd(x, conv_w, conv_b)
    jax.block_until_ready(out)
    assert out.shape == (N, C, 2 * H, 2 * W)
    max_err = float(jnp.max(jnp.abs(out - ref)))
    assert max_err < 3e-2, f"mismatch vs reference (nchw): max abs err {max_err}"

    # 2) Transpose-free NHWC entry point, multi-row-tile path.
    x_nhwc = jnp.transpose(x, (0, 2, 3, 1))
    fwd_nhwc = jax.jit(functools.partial(upsample_forward_nhwc, row_tile=8))
    out_nhwc = fwd_nhwc(x_nhwc, conv_w, conv_b)
    jax.block_until_ready(out_nhwc)
    ref_nhwc = jnp.transpose(ref, (0, 2, 3, 1))
    max_err2 = float(jnp.max(jnp.abs(out_nhwc - ref_nhwc)))
    assert max_err2 < 3e-2, f"mismatch vs reference (nhwc, row_tile=8): max abs err {max_err2}"

    print("KERNEL_OK")
</pallas_src>

<mosaic_0001>
module attributes {stable_mosaic.version = 11 : i64} {
  func.func @_upsample_conv_kernel(%arg0: i32, %arg1: i32, %arg2: memref<1x18x18x64xf32, #tpu.memory_space<vmem>>, %arg3: memref<576x256xbf16, #tpu.memory_space<vmem>>, %arg4: memref<1x256xf32, #tpu.memory_space<vmem>>, %arg5: memref<1x16x2x16x128xf32, #tpu.memory_space<vmem>>) attributes {dimension_semantics = [#tpu.dimension_semantics<parallel>, #tpu.dimension_semantics<parallel>], iteration_bounds = array<i64: 2, 1>, scalar_prefetch = 0 : i64, scratch_operands = 0 : i64, tpu.core_type = #tpu.core_type<tc>, window_params = [{transform_indices = @transform_0, window_bounds = array<i64: 1, 18, 18, 64>}, {pipeline_mode = #tpu.pipeline_mode<synchronous>, transform_indices = @transform_1, window_bounds = array<i64: 576, 256>}, {pipeline_mode = #tpu.pipeline_mode<synchronous>, transform_indices = @transform_2, window_bounds = array<i64: 1, 256>}, {transform_indices = @transform_3, window_bounds = array<i64: 1, 16, 2, 16, 128>}]} {
    %c16_i32 = arith.constant 16 : i32
    %0 = arith.muli %arg1, %c16_i32 : i32
    %1 = tpu.assume_multiple %0, 16 : i32
    %c0 = arith.constant 0 : index
    %2 = arith.index_cast %1 : i32 to index
    %c0_0 = arith.constant 0 : index
    %c0_1 = arith.constant 0 : index
    %3 = vector.load %arg2[%c0, %2, %c0_0, %c0_1] : memref<1x18x18x64xf32, #tpu.memory_space<vmem>>, vector<1x18x18x64xf32>
    %4 = vector.shape_cast %3 : vector<1x18x18x64xf32> to vector<18x18x64xf32>
    %5 = arith.truncf %4 : vector<18x18x64xf32> to vector<18x18x64xbf16>
    %6 = vector.extract_strided_slice %5 {offsets = [0, 0, 0], sizes = [18, 16, 64], strides = [1, 1, 1]} : vector<18x18x64xbf16> to vector<18x16x64xbf16>
    %7 = vector.extract_strided_slice %5 {offsets = [0, 1, 0], sizes = [18, 16, 64], strides = [1, 1, 1]} : vector<18x18x64xbf16> to vector<18x16x64xbf16>
    %8 = vector.extract_strided_slice %5 {offsets = [0, 2, 0], sizes = [18, 16, 64], strides = [1, 1, 1]} : vector<18x18x64xbf16> to vector<18x16x64xbf16>
    %9 = vector.extract_strided_slice %6 {offsets = [0, 0, 0], sizes = [16, 16, 64], strides = [1, 1, 1]} : vector<18x16x64xbf16> to vector<16x16x64xbf16>
    %10 = vector.shape_cast %9 : vector<16x16x64xbf16> to vector<256x64xbf16>
    %11 = vector.extract_strided_slice %7 {offsets = [0, 0, 0], sizes = [16, 16, 64], strides = [1, 1, 1]} : vector<18x16x64xbf16> to vector<16x16x64xbf16>
    %12 = vector.shape_cast %11 : vector<16x16x64xbf16> to vector<256x64xbf16>
    %13 = vector.extract_strided_slice %8 {offsets = [0, 0, 0], sizes = [16, 16, 64], strides = [1, 1, 1]} : vector<18x16x64xbf16> to vector<16x16x64xbf16>
    %14 = vector.shape_cast %13 : vector<16x16x64xbf16> to vector<256x64xbf16>
    %15 = vector.extract_strided_slice %6 {offsets = [1, 0, 0], sizes = [16, 16, 64], strides = [1, 1, 1]} : vector<18x16x64xbf16> to vector<16x16x64xbf16>
    %16 = vector.shape_cast %15 : vector<16x16x64xbf16> to vector<256x64xbf16>
    %17 = vector.extract_strided_slice %7 {offsets = [1, 0, 0], sizes = [16, 16, 64], strides = [1, 1, 1]} : vector<18x16x64xbf16> to vector<16x16x64xbf16>
    %18 = vector.shape_cast %17 : vector<16x16x64xbf16> to vector<256x64xbf16>
    %19 = vector.extract_strided_slice %8 {offsets = [1, 0, 0], sizes = [16, 16, 64], strides = [1, 1, 1]} : vector<18x16x64xbf16> to vector<16x16x64xbf16>
    %20 = vector.shape_cast %19 : vector<16x16x64xbf16> to vector<256x64xbf16>
    %21 = vector.extract_strided_slice %6 {offsets = [2, 0, 0], sizes = [16, 16, 64], strides = [1, 1, 1]} : vector<18x16x64xbf16> to vector<16x16x64xbf16>
    %22 = vector.shape_cast %21 : vector<16x16x64xbf16> to vector<256x64xbf16>
    %23 = vector.extract_strided_slice %7 {offsets = [2, 0, 0], sizes = [16, 16, 64], strides = [1, 1, 1]} : vector<18x16x64xbf16> to vector<16x16x64xbf16>
    %24 = vector.shape_cast %23 : vector<16x16x64xbf16> to vector<256x64xbf16>
    %25 = vector.extract_strided_slice %8 {offsets = [2, 0, 0], sizes = [16, 16, 64], strides = [1, 1, 1]} : vector<18x16x64xbf16> to vector<16x16x64xbf16>
    %26 = vector.shape_cast %25 : vector<16x16x64xbf16> to vector<256x64xbf16>
    %27 = tpu.concatenate %10, %12, %14, %16, %18, %20, %22, %24, %26 in 1 : vector<256x64xbf16>, vector<256x64xbf16>, vector<256x64xbf16>, vector<256x64xbf16>, vector<256x64xbf16>, vector<256x64xbf16>, vector<256x64xbf16>, vector<256x64xbf16>, vector<256x64xbf16> -> vector<256x576xbf16>
    %c0_2 = arith.constant 0 : index
    %c0_3 = arith.constant 0 : index
    %28 = vector.load %arg3[%c0_2, %c0_3] : memref<576x256xbf16, #tpu.memory_space<vmem>>, vector<576x256xbf16>
    %cst = arith.constant dense<0.000000e+00> : vector<256x256xf32>
    %29 = tpu.matmul %27, %28, %cst {dimension_numbers = #tpu.dot_dimension_numbers<[1], [0], [0], [1], [0, 0, 1, 1], [], []>} : vector<256x576xbf16>, vector<576x256xbf16>, vector<256x256xf32> -> vector<256x256xf32>
    %c0_4 = arith.constant 0 : index
    %c0_5 = arith.constant 0 : index
    %30 = vector.load %arg4[%c0_4, %c0_5] : memref<1x256xf32, #tpu.memory_space<vmem>>, vector<1x256xf32>
    %31 = vector.broadcast %30 : vector<1x256xf32> to vector<256x256xf32>
    %32 = arith.addf %29, %31 : vector<256x256xf32>
    %33 = vector.extract_strided_slice %32 {offsets = [0, 0], sizes = [256, 128], strides = [1, 1]} : vector<256x256xf32> to vector<256x128xf32>
    %34 = vector.shape_cast %33 : vector<256x128xf32> to vector<16x16x128xf32>
    %35 = vector.extract_strided_slice %32 {offsets = [0, 128], sizes = [256, 128], strides = [1, 1]} : vector<256x256xf32> to vector<256x128xf32>
    %36 = vector.shape_cast %35 : vector<256x128xf32> to vector<16x16x128xf32>
    %c0_6 = arith.constant 0 : index
    %c0_7 = arith.constant 0 : index
    %c0_8 = arith.constant 0 : index
    %c0_9 = arith.constant 0 : index
    %c0_10 = arith.constant 0 : index
    %37 = vector.load %arg5[%c0_6, %c0_7, %c0_8, %c0_9, %c0_10] : memref<1x16x2x16x128xf32, #tpu.memory_space<vmem>>, vector<1x16x1x16x128xf32>
    %38 = vector.shape_cast %37 : vector<1x16x1x16x128xf32> to vector<16x16x128xf32>
    %39 = vector.shape_cast %34 : vector<16x16x128xf32> to vector<1x16x1x16x128xf32>
    tpu.vector_store %arg5[%c0_6, %c0_7, %c0_8, %c0_9, %c0_10], %39 {strides = array<i32>} : memref<1x16x2x16x128xf32, #tpu.memory_space<vmem>>, vector<1x16x1x16x128xf32>,
    %c0_11 = arith.constant 0 : index
    %c0_12 = arith.constant 0 : index
    %c1 = arith.constant 1 : index
    %c0_13 = arith.constant 0 : index
    %c0_14 = arith.constant 0 : index
    %40 = vector.load %arg5[%c0_11, %c0_12, %c1, %c0_13, %c0_14] : memref<1x16x2x16x128xf32, #tpu.memory_space<vmem>>, vector<1x16x1x16x128xf32>
    %41 = vector.shape_cast %40 : vector<1x16x1x16x128xf32> to vector<16x16x128xf32>
    %42 = vector.shape_cast %36 : vector<16x16x128xf32> to vector<1x16x1x16x128xf32>
    tpu.vector_store %arg5[%c0_11, %c0_12, %c1, %c0_13, %c0_14], %42 {strides = array<i32>} : memref<1x16x2x16x128xf32, #tpu.memory_space<vmem>>, vector<1x16x1x16x128xf32>,
    return
  }
  func.func @transform_0(%arg0: i32, %arg1: i32) -> (i32, i32, i32, i32) {
    %c0_i32 = arith.constant 0 : i32
    %c0_i32_0 = arith.constant 0 : i32
    %c0_i32_1 = arith.constant 0 : i32
    %c0_i32_2 = arith.constant 0 : i32
    return %arg0, %c0_i32, %c0_i32_0, %c0_i32_1 : i32, i32, i32, i32
  }
  func.func @transform_1(%arg0: i32, %arg1: i32) -> (i32, i32) {
    %c0_i32 = arith.constant 0 : i32
    %c0_i32_0 = arith.constant 0 : i32
    %c0_i32_1 = arith.constant 0 : i32
    return %c0_i32, %c0_i32_0 : i32, i32
  }
  func.func @transform_2(%arg0: i32, %arg1: i32) -> (i32, i32) {
    %c0_i32 = arith.constant 0 : i32
    %c0_i32_0 = arith.constant 0 : i32
    %c0_i32_1 = arith.constant 0 : i32
    return %c0_i32, %c0_i32_0 : i32, i32
  }
  func.func @transform_3(%arg0: i32, %arg1: i32) -> (i32, i32, i32, i32, i32) {
    %c0_i32 = arith.constant 0 : i32
    %c0_i32_0 = arith.constant 0 : i32
    %c0_i32_1 = arith.constant 0 : i32
    %c0_i32_2 = arith.constant 0 : i32
    return %arg0, %arg1, %c0_i32, %c0_i32_0, %c0_i32_1 : i32, i32, i32, i32, i32
  }
}

</mosaic_0001>

<bundles_post_ra>
// kernel: tile.9
= control target key start
LH: loop header
LB: loop body
LE: loop exit
PB: predicated region body
PF: predicated region fallthrough
CT: control target
= control target key end

     0   :  { %s6_s8 = smov 3  ;;  %vm8_vm0 = vcmask 523264   ;;  %s30_s9 = smov 64   ;;  %vm15_vm1 = vcmask 1048064   ;;  %s50_s0 = inlined_call_operand.vmem [shape: f32[4,64], index: 0, kind: input, shape index: {}]   ;;  %s51_s1 = inlined_call_operand.vmem [shape: f32[1,256], index: 1, kind: output, shape index: {}]  }
   0x1   :  { %v4_v0 = vld [vmem:[%s50_s0] sm:$0xf]  ;;  %s11_s0 = smov 3 }
   0x2   :  { %5 = vst [vmem:[#allocation1] sm:$0xf] %v4_v0 }
   0x9   :  { %v12_v1 = vld [vmem:[#allocation1 + $0x1] ss:$2 sm:%s11_s0]   ;;  %v7_v2 = vld [vmem:[#allocation1] ss:$2 sm:%s6_s8]  }
   0xa   :  { %13 = vrot.lane.b32.xlu0 %v12_v1, %s30_s9  ;;  %9 = vst.msk [vmem:[#allocation0] ss:$8 sm:$0x3] %vm8_vm0, %v7_v2  }
  0x7c   :  { %v14_v3 = vpop.permute.xlu0 %13  }
  0x7d   :  { %16 = vst.msk [vmem:[#allocation0] ss:$8 sm:$0x3] %vm15_vm1, %v14_v3  }
  0x84   :  { %v20_v4 = vld [vmem:[#allocation0] sm:$0x1]  ;;  %v24_v5 = vld [vmem:[#allocation0 + $0x8] sm:$0x1] }
  0x85   :  { %22 = vst [vmem:[%s51_s1] sm:$0x1] %v20_v4  ;;  %28 = vst [vmem:[%s51_s1 + $0x1] sm:$0x1] %v24_v5 }

// kernel: tile.8
= control target key start
LH: loop header
LB: loop body
LE: loop exit
PB: predicated region body
PF: predicated region fallthrough
CT: control target
= control target key end

     0   :  { %s22_s0 = inlined_call_operand.vmem [shape: f32[64], index: 0, kind: input, shape index: {}]   ;;  %s23_s1 = inlined_call_operand.vmem [shape: f32[4,64], index: 1, kind: output, shape index: {}]  }
   0x1   :  { %v4_v0 = vld [vmem:[%s22_s0] ss:$0 sm:$0xff] }
   0x2   :  { %5 = vst [vmem:[%s23_s1] sm:$0xf] %v4_v0 }

// kernel: upsample_forward.1
= control target key start
LH: loop header
LB: loop body
LE: loop exit
PB: predicated region body
PF: predicated region fallthrough
CT: control target
= control target key end

     0   :  { %s2631_s12 = smov 0   ;;  %s2633_s13 = smov 0   ;;  %s3772_s0 = inlined_call_operand.vmem [shape: f32[2,18,18,64], index: 0, kind: input, shape index: {}]   ;;  %s3773_s1 = inlined_call_operand.vmem [shape: bf16[576,256], index: 1, kind: input, shape index: {}]   ;;  %s3774_s2 = inlined_call_operand.vmem [shape: f32[1,256], index: 2, kind: input, shape index: {}]   ;;  %s3775_s3 = inlined_call_operand.vmem [shape: f32[2,16,2,16,128], index: 3, kind: output, shape index: {}]  }
   0x1   :  { %s2635_s14 = smov 0  }
   0x2 LB: > { %s25_s15 = sadd.s32 1, %s2603_s13  ;;  %p2096_p0 = scmp.ge.s32.totalorder %s2607_s14, 1  ;;  %s2607_s14 = sphi %s2635_s14, %s13_s14   ;;  %s2603_s13 = sphi %s2633_s13, %s3870_s13   ;;  %s2599_s12 = sphi %s2631_s12, %s3869_s12  }
   0x3   : > { %p27_p1 = scmp.ge.s32.totalorder %s25_s15, 2  ;;  %p151_p2 = scmp.lt.s32.totalorder %s2607_s14, 3 }
   0x5   : > { %s3872_s15 = smov (%p27_p1, %s25_s15), 0  ;;  %p152_p3 = pnand %p2096_p0, %p151_p2 }
   0x7   : > { %155 = sbr.rel (%p152_p3) target bundleno = 553 (0x229), region = 32 }
   0xe   : > { %p180_p4 = scmp.lt.s32.totalorder %s2599_s12, 1  ;;  %v2474_v0 = vld [vmem:[%s3773_s1 + $0x4] ss:$8 sps:$4 sm:$0xff]   ;;  %v2476_v1 = vld [vmem:[%s3773_s1] ss:$8 sps:$4 sm:$0xff]   ;;  %s2609_s11 = smov 64  }
   0xf   : > { %v2660_v2 = vld [vmem:[%s3773_s1 + $0x104] ss:$8 sps:$4 sm:$0xff]   ;;  %1359 = vmatprep.subr.bf16.mxu1 %v2474_v0  ;;  %v2479_v3 = vld [vmem:[%s3773_s1 + $0x14] ss:$8 sps:$4 sm:$0xff]   ;;  %v2481_v4 = vld [vmem:[%s3773_s1 + $0x100] ss:$8 sps:$4 sm:$0xff]  }
  0x10   : > { %s3874_s12 = smov (!%p180_p4, %s2599_s12), 1  ;;  %1360 = vmatpush1.bf16.msra.mxu1 %v2476_v1  ;;  %1552 = vmatprep.subr.bf16.mxu0 %v2660_v2  ;;  %v2482_v5 = vld [vmem:[%s3773_s1 + $0x10] ss:$8 sps:$4 sm:$0xff]   ;;  %v2483_v6 = vld [vmem:[%s3773_s1 + $0x114] ss:$8 sps:$4 sm:$0xff]   ;;  %vm515_vm1 = vcmask 1046528  }
  0x11   : > { %s2447_s24 = smul.u32 432, %s3874_s12  ;;  %1361 = vmatprep.subr.bf16.mxu1 %v2479_v3  ;;  %1553 = vmatpush1.bf16.msra.mxu0 %v2481_v4  ;;  %v2485_v7 = vld [vmem:[%s3773_s1 + $0x24] ss:$8 sps:$4 sm:$0xff]   ;;  %v2487_v8 = vld [vmem:[%s3773_s1 + $0x110] ss:$8 sps:$4 sm:$0xff]   ;;  %vm698_vm2 = vcmask 523264  }
  0x12   : > { %1554 = vmatprep.subr.bf16.mxu0 %v2483_v6  ;;  %vm290_vm0 = vsmask.f32 7424  ;;  %v2488_v59 = vld [vmem:[%s3773_s1 + $0x20] ss:$8 sps:$4 sm:$0xff]   ;;  %v2752_v0 = vld [vmem:[%s3773_s1 + $0x124] ss:$8 sps:$4 sm:$0xff]  }
  0x13   : > { %s2679_s6 = scalar_lea.vmem %s3772_s0, %s2447_s24  ;;  %s2222_s22 = sshll.u32 %s3874_s12, 9 }
  0x14   : > { %v203_v9 = vld [vmem:[%s2679_s6 + $0x18] sm:$0xff]  ;;  %v204_v10 = vld [vmem:[%s2679_s6 + $0x20] sm:$0xff]  ;;  %v206_v11 = vld [vmem:[%s2679_s6 + $0x30] sm:$0xff]  ;;  %1362 = vmatpush1.bf16.msra.mxu1 %v2482_v5  ;;  %s3611_s23 = scalar_lea.vmem %s3775_s3, %s2222_s22 }
  0x15   : > { %v2690_v12 = vpack.c.bf16 %v204_v10, %v203_v9  ;;  %v207_v13 = vld [vmem:[%s2679_s6 + $0x38] sm:$0xff]  ;;  %v208_v14 = vld [vmem:[%s2679_s6 + $0x40] sm:$0x3]  ;;  %v201_v18 = vld [vmem:[%s2679_s6 + $0x8] sm:$0xff]  ;;  %1363 = vmatprep.subr.bf16.mxu1 %v2485_v7  ;;  %1555 = vmatpush1.bf16.msra.mxu0 %v2487_v8 }
  0x16   : > { %v200_v15 = vld [vmem:[%s2679_s6] sm:$0xff]  ;;  %v2695_v16 = vpack.c.bf16 %v207_v13, %v206_v11  ;;  %v2697_v17 = vpack.c.bf16 %v208_v14, %v208_v14  ;;  %v202_v19 = vld [vmem:[%s2679_s6 + $0x10] sm:$0x3]  ;;  %v205_v20 = vld [vmem:[%s2679_s6 + $0x28] sm:$0x3]  ;;  %1556 = vmatprep.subr.bf16.mxu0 %v2752_v0 }
  0x17   : > { %630 = vrot.lane.b32.xlu0 %v2690_v12, %s2609_s11  ;;  %v2704_v21 = vpack.c.bf16 %v201_v18, %v200_v15  ;;  %v2706_v22 = vpack.c.bf16 %v202_v19, %v202_v19  ;;  %v257_v23 = vpack.c.bf16 %v205_v20, %v205_v20  ;;  %v209_v27 = vld [vmem:[%s2679_s6 + $0x48] sm:$0xff]  ;;  %v210_v28 = vld [vmem:[%s2679_s6 + $0x50] sm:$0xff]  ;;  %v519_v32 = vrot.slane %v2690_v12, 1  ;;  %v211_v33 = vld [vmem:[%s2679_s6 + $0x58] sm:$0x3] }
  0x18   : > { %v316_v24 = vshrl.u32 %v2695_v16, 16  ;;  %v318_v25 = vshll.u32 %v2695_v16, 16  ;;  %v323_v26 = vshll.u32 %v2697_v17, 16  ;;  %v304_v36 = vshrl.u32 %v2690_v12, 16  ;;  %v212_v46 = vld [vmem:[%s2679_s6 + $0x60] sm:$0xff]  ;;  %v213_v47 = vld [vmem:[%s2679_s6 + $0x68] sm:$0xff]  ;;  %1364 = vmatpush1.bf16.msra.mxu1 %v2488_v59 }
  0x19   : > { %v292_v29 = vshrl.u32 %v2704_v21, 16  ;;  %v294_v30 = vshll.u32 %v2704_v21, 16  ;;  %v299_v31 = vshll.u32 %v2706_v22, 16  ;;  %v306_v37 = vshll.u32 %v2690_v12, 16  ;;  %v214_v51 = vld [vmem:[%s2679_s6 + $0x70] sm:$0x3] }
  0x1a   : > { %v320_v34 = vrot.slane %v318_v25, 1  ;;  %v325_v35 = vrot.slane %v323_v26, 1  ;;  %v520_v40 = vrot.slane %v257_v23, 1  ;;  %v2720_v41 = vpack.c.bf16 %v210_v28, %v209_v27  ;;  %v215_v57 = vld [vmem:[%s2679_s6 + $0x78] sm:$0xff]  ;;  %v216_v58 = vld [vmem:[%s2679_s6 + $0x80] sm:$0xff]  ;;  %v218_v11 = vld [vmem:[%s2679_s6 + $0x90] sm:$0xff] }
  0x1b   : > { %v296_v38 = vrot.slane %v294_v30, 1  ;;  %v301_v39 = vrot.slane %v299_v31, 1  ;;  %v308_v43 = vrot.slane %v306_v37, 1  ;;  %v311_v44 = vshll.u32 %v257_v23, 16  ;;  %v217_v5 = vld [vmem:[%s2679_s6 + $0x88] sm:$0x3] }
  0x1c   : > { %v321_v42 = vor.u32 %v320_v34, %v316_v24  ;;  %v2722_v45 = vpack.c.bf16 %v211_v33, %v211_v33  ;;  %v328_v49 = vshrl.u32 %v2720_v41, 16  ;;  %v330_v50 = vshll.u32 %v2720_v41, 16  ;;  %v2491_v7 = vld [vmem:[%s3773_s1 + $0x34] ss:$8 sps:$4 sm:$0xff]   ;;  %v2765_v8 = vld [vmem:[%s3773_s1 + $0x120] ss:$8 sps:$4 sm:$0xff]  }
  0x1d   : > { %v297_v48 = vor.u32 %v296_v38, %v292_v29  ;;  %v2736_v56 = vpack.c.bf16 %v213_v47, %v212_v46  ;;  %v2745_v60 = vsel %vm515_vm1, %v519_v32, %v520_v40  ;;  %v309_v61 = vor.u32 %v308_v43, %v304_v36  ;;  %v219_v13 = vld [vmem:[%s2679_s6 + $0x98] sm:$0xff]  ;;  %1365 = vmatprep.subr.bf16.mxu1 %v2491_v7  ;;  %v2497_v26 = vld [vmem:[%s3773_s1 + $0x44] ss:$8 sps:$4 sm:$0xff]   ;;  %v2500_v28 = vld [vmem:[%s3773_s1 + $0x40] ss:$8 sps:$4 sm:$0xff]  }
  0x1e   : > { %v2730_v52 = vsel %vm290_vm0, %v321_v42, %v325_v35  ;;  %v335_v53 = vshll.u32 %v2722_v45, 16  ;;  %v332_v55 = vrot.slane %v330_v50, 1  ;;  %v313_v62 = vrot.slane %v311_v44, 1  ;;  %v2494_v14 = vld [vmem:[%s3773_s1 + $0x30] ss:$8 sps:$4 sm:$0xff]   ;;  %1557 = vmatpush1.bf16.msra.mxu0 %v2765_v8  ;;  %v221_v35 = vld [vmem:[%s2679_s6 + $0xa8] sm:$0xff] }
  0x1f   : > { %602 = vrot.lane.b32.xlu1 %v2730_v52, %s2609_s11  ;;  %v302_v54 = vsel %vm290_vm0, %v297_v48, %v301_v39  ;;  %v2747_v63 = vpack.c.bf16 %v214_v51, %v214_v51  ;;  %v342_v4 = vshll.u32 %v2736_v56, 16  ;;  %v2756_v6 = vpack.c.bf16 %v216_v58, %v215_v57  ;;  %v2801_v27 = vld [vmem:[%s3773_s1 + $0x130] ss:$8 sps:$4 sm:$0xff]   ;;  %1366 = vmatpush1.bf16.msra.mxu1 %v2494_v14  ;;  %v220_v30 = vld [vmem:[%s2679_s6 + $0xa0] sm:$0x3] }
  0x20   : > { %598 = vrot.lane.b32.xlu0 %v302_v54, %s2609_s11  ;;  %v333_v1 = vor.u32 %v332_v55, %v328_v49  ;;  %v337_v3 = vrot.slane %v335_v53, 1  ;;  %v522_v9 = vrot.slane %v2695_v16, 1  ;;  %v523_v10 = vrot.slane %v2697_v17, 1  ;;  %v2786_v17 = vld [vmem:[%s3773_s1 + $0x134] ss:$8 sps:$4 sm:$0xff]   ;;  %1367 = vmatprep.subr.bf16.mxu1 %v2497_v26  ;;  %v224_v7 = vld [vmem:[%s2679_s6 + $0xc0] sm:$0xff] }
  0x21   : > { %v2779_v15 = vsel %vm290_vm0, %v309_v61, %v313_v62  ;;  %v340_v18 = vshrl.u32 %v2736_v56, 16  ;;  %v344_v19 = vrot.slane %v342_v4, 1  ;;  %v347_v20 = vshll.u32 %v2747_v63, 16  ;;  %1558 = vmatprep.subr.bf16.mxu0 %v2786_v17  ;;  %v2822_v36 = vld [vmem:[%s3773_s1 + $0x144] ss:$8 sps:$4 sm:$0xff]   ;;  %v222_v42 = vld [vmem:[%s2679_s6 + $0xb0] sm:$0xff] }
  0x22   : > { %v2789_v23 = vsel %vm290_vm0, %v333_v1, %v337_v3  ;;  %v2791_v24 = vpack.c.bf16 %v217_v5, %v217_v5  ;;  %v354_v25 = vshll.u32 %v2756_v6, 16  ;;  %v2810_v29 = vsel %vm515_vm1, %v522_v9, %v523_v10  ;;  %1559 = vmatpush1.bf16.msra.mxu0 %v2801_v27  ;;  %v2503_v43 = vld [vmem:[%s3773_s1 + $0x54] ss:$8 sps:$4 sm:$0xff]   ;;  %v2838_v44 = vld [vmem:[%s3773_s1 + $0x140] ss:$8 sps:$4 sm:$0xff]  }
  0x23   : > { %662 = vrot.lane.b32.xlu1 %v2745_v60, %s2609_s11  ;;  %v345_v31 = vor.u32 %v344_v19, %v340_v18  ;;  %v349_v32 = vrot.slane %v347_v20, 1  ;;  %v525_v33 = vrot.slane %v2720_v41, 1  ;;  %v2816_v34 = vpack.c.bf16 %v219_v13, %v218_v11  ;;  %1368 = vmatpush1.bf16.msra.mxu1 %v2500_v28  ;;  %v2846_v46 = vld [vmem:[%s3773_s1 + $0x154] ss:$8 sps:$4 sm:$0xff]   ;;  %v223_v54 = vld [vmem:[%s2679_s6 + $0xb8] sm:$0x3] }
  0x24   : > { %632 = vrot.lane.b32.xlu0 %v2695_v16, %s2609_s11  ;;  %v526_v37 = vrot.slane %v2722_v45, 1  ;;  %v352_v38 = vshrl.u32 %v2756_v6, 16  ;;  %v356_v39 = vrot.slane %v354_v25, 1  ;;  %v359_v40 = vshll.u32 %v2791_v24, 16  ;;  %1560 = vmatprep.subr.bf16.mxu0 %v2822_v36  ;;  %v2506_v45 = vld [vmem:[%s3773_s1 + $0x50] ss:$8 sps:$4 sm:$0xff]  }
  0x25   : > { %v2851_v47 = vsel %vm290_vm0, %v345_v31, %v349_v32  ;;  %v2853_v48 = vpack.c.bf16 %v220_v30, %v220_v30  ;;  %v366_v49 = vshll.u32 %v2816_v34, 16  ;;  %1369 = vmatprep.subr.bf16.mxu1 %v2503_v43  ;;  %v2860_v55 = vpack.c.bf16 %v222_v42, %v221_v35  ;;  %v2509_v57 = vld [vmem:[%s3773_s1 + $0x64] ss:$8 sps:$4 sm:$0xff]   ;;  %v2869_v58 = vld [vmem:[%s3773_s1 + $0x150] ss:$8 sps:$4 sm:$0xff]  }
  0x26   : > { %v2857_v50 = vsel %vm515_vm1, %v525_v33, %v526_v37  ;;  %v357_v51 = vor.u32 %v356_v39, %v352_v38  ;;  %v361_v53 = vrot.slane %v359_v40, 1  ;;  %1561 = vmatpush1.bf16.msra.mxu0 %v2838_v44  ;;  %v2512_v59 = vld [vmem:[%s3773_s1 + $0x60] ss:$8 sps:$4 sm:$0xff]   ;;  %v528_v61 = vrot.slane %v2736_v56, 1  ;;  %v2882_v1 = vld [vmem:[%s3773_s1 + $0x164] ss:$8 sps:$4 sm:$0xff]  }
  0x27   : > { %600 = vrot.lane.b32.xlu1 %v2779_v15, %s2609_s11  ;;  %3809 = vst [vmem:[#allocation2_spill] sm:$0xff] %v2860_v55  ;;  %1370 = vmatpush1.bf16.msra.mxu1 %v2506_v45  ;;  %v529_v62 = vrot.slane %v2747_v63, 1  ;;  %v364_v3 = vshrl.u32 %v2816_v34, 16  ;;  %v368_v4 = vrot.slane %v366_v49, 1  ;;  %v371_v5 = vshll.u32 %v2853_v48, 16  ;;  %v225_v9 = vld [vmem:[%s2679_s6 + $0xc8] sm:$0xff] }
  0x28   : > { %604 = vrot.lane.b32.xlu0 %v2789_v23, %s2609_s11  ;;  %1562 = vmatprep.subr.bf16.mxu0 %v2846_v46  ;;  %v2891_v63 = vsel %vm290_vm0, %v357_v51, %v361_v53  ;;  %v2893_v10 = vpack.c.bf16 %v223_v54, %v223_v54  ;;  %v378_v11 = vshll.u32 %v2860_v55, 16  ;;  %v2515_v13 = vld [vmem:[%s3773_s1 + $0x74] ss:$8 sps:$4 sm:$0xff]   ;;  %v2903_v14 = vld [vmem:[%s3773_s1 + $0x160] ss:$8 sps:$4 sm:$0xff]   ;;  %v531_v20 = vrot.slane %v2756_v6, 1 }
  0x29   : > { %1371 = vmatprep.subr.bf16.mxu1 %v2509_v57  ;;  %3810 = vst [vmem:[#allocation3_spill] sm:$0xff] %v2891_v63  ;;  %v2518_v18 = vld [vmem:[%s3773_s1 + $0x70] ss:$8 sps:$4 sm:$0xff]   ;;  %v2912_v19 = vsel %vm515_vm1, %v528_v61, %v529_v62  ;;  %v532_v25 = vrot.slane %v2791_v24, 1  ;;  %v2920_v28 = vld [vmem:[%s3773_s1 + $0x174] ss:$8 sps:$4 sm:$0xff]   ;;  %v369_v30 = vor.u32 %v368_v4, %v364_v3  ;;  %v2925_v33 = vpack.c.bf16 %v225_v9, %v224_v7 }
  0x2a   : > { %1563 = vmatpush1.bf16.msra.mxu0 %v2869_v58  ;;  %v226_v26 = vld [vmem:[%s2679_s6 + $0xd0] sm:$0x3]  ;;  %v373_v31 = vrot.slane %v371_v5, 1  ;;  %v376_v32 = vshrl.u32 %v2860_v55, 16  ;;  %v227_v35 = vld [vmem:[%s2679_s6 + $0xd8] sm:$0xff]  ;;  %v228_v37 = vld [vmem:[%s2679_s6 + $0xe0] sm:$0xff] }
  0x2b   : > { %664 = vrot.lane.b32.xlu1 %v2810_v29, %s2609_s11  ;;  %1372 = vmatpush1.bf16.msra.mxu1 %v2512_v59  ;;  %3811 = vst [vmem:[#allocation4_spill] sm:$0xff] %v2925_v33  ;;  %v2521_v24 = vld [vmem:[%s3773_s1 + $0x84] ss:$8 sps:$4 sm:$0xff]   ;;  %v380_v38 = vrot.slane %v378_v11, 1  ;;  %v383_v39 = vshll.u32 %v2893_v10, 16  ;;  %v2955_v49 = vpack.c.bf16 %v226_v26, %v226_v26  ;;  %v390_v51 = vshll.u32 %v2925_v33, 16 }
  0x2c   : > { %634 = vrot.lane.b32.xlu0 %v2720_v41, %s2609_s11  ;;  %1564 = vmatprep.subr.bf16.mxu0 %v2882_v1  ;;  %v2937_v40 = vld [vmem:[%s3773_s1 + $0x170] ss:$8 sps:$4 sm:$0xff]   ;;  %v2524_v42 = vld [vmem:[%s3773_s1 + $0x80] ss:$8 sps:$4 sm:$0xff]   ;;  %v2946_v43 = vld [vmem:[%s3773_s1 + $0x184] ss:$8 sps:$4 sm:$0xff]   ;;  %v2953_v45 = vsel %vm290_vm0, %v369_v30, %v373_v31  ;;  %v2963_v57 = vsel %vm515_vm1, %v531_v20, %v532_v25  ;;  %v2965_v62 = vpack.c.bf16 %v228_v37, %v227_v35 }
  0x2d   : > { %1373 = vmatprep.subr.bf16.mxu1 %v2515_v13  ;;  %3812 = vst [vmem:[#allocation5_spill] sm:$0xff] %v2953_v45  ;;  %v229_v53 = vld [vmem:[%s2679_s6 + $0xe8] sm:$0x3]  ;;  %v2527_v54 = vld [vmem:[%s3773_s1 + $0x94] ss:$8 sps:$4 sm:$0xff]   ;;  %v381_v59 = vor.u32 %v380_v38, %v376_v32  ;;  %v385_v61 = vrot.slane %v383_v39, 1 }
  0x2e   : > { %1565 = vmatpush1.bf16.msra.mxu0 %v2903_v14  ;;  %v2971_v3 = vld [vmem:[%s3773_s1 + $0x180] ss:$8 sps:$4 sm:$0xff]   ;;  %v2530_v4 = vld [vmem:[%s3773_s1 + $0x90] ss:$8 sps:$4 sm:$0xff]   ;;  %v2980_v5 = vld [vmem:[%s3773_s1 + $0x194] ss:$8 sps:$4 sm:$0xff]   ;;  %v2996_v26 = vpack.c.bf16 %v229_v53, %v229_v53 }
  0x2f   : > { %606 = vrot.lane.b32.xlu1 %v2851_v47, %s2609_s11  ;;  %1374 = vmatpush1.bf16.msra.mxu1 %v2518_v18  ;;  %3813 = vst [vmem:[#allocation6_spill] sm:$0xff] %v2971_v3  ;;  %3814 = vst [vmem:[#allocation7_spill] sm:$0xff] %v2980_v5  ;;  %v534_v7 = vrot.slane %v2816_v34, 1  ;;  %v535_v9 = vrot.slane %v2853_v48, 1  ;;  %v2533_v11 = vld [vmem:[%s3773_s1 + $0xa4] ss:$8 sps:$4 sm:$0xff]   ;;  %v2994_v25 = vsel %vm290_vm0, %v381_v59, %v385_v61 }
  0x30   : > { %666 = vrot.lane.b32.xlu0 %v2857_v50, %s2609_s11  ;;  %1566 = vmatprep.subr.bf16.mxu0 %v2920_v28  ;;  %v388_v13 = vshrl.u32 %v2925_v33, 16  ;;  %v392_v18 = vrot.slane %v390_v51, 1  ;;  %v395_v20 = vshll.u32 %v2955_v49, 16  ;;  %3815 = vst [vmem:[#allocation8_spill] sm:$0xff] %v2994_v25  ;;  %v402_v48 = vshll.u32 %v2965_v62, 16  ;;  %v230_v53 = vld [vmem:[%s2679_s6 + $0xf0] sm:$0xff] }
  0x31   : > { %1375 = vmatprep.subr.bf16.mxu1 %v2521_v24  ;;  %v3003_v30 = vld [vmem:[%s3773_s1 + $0x190] ss:$8 sps:$4 sm:$0xff]   ;;  %v2536_v31 = vld [vmem:[%s3773_s1 + $0xa0] ss:$8 sps:$4 sm:$0xff]   ;;  %v3012_v32 = vld [vmem:[%s3773_s1 + $0x1a4] ss:$8 sps:$4 sm:$0xff]   ;;  %v3017_v35 = vsel %vm515_vm1, %v534_v7, %v535_v9 }
  0x32   : > { %1567 = vmatpush1.bf16.msra.mxu0 %v2937_v40  ;;  %3816 = vst [vmem:[#allocation9_spill] sm:$0xff] %v3003_v30  ;;  %3817 = vst [vmem:[#allocation10_spill] sm:$0xff] %v3012_v32  ;;  %v537_v37 = vrot.slane %v2860_v55, 1  ;;  %v2539_v24 = vld [vmem:[%s3773_s1 + $0xb4] ss:$8 sps:$4 sm:$0xff]   ;;  %v393_v38 = vor.u32 %v392_v18, %v388_v13  ;;  %v397_v39 = vrot.slane %v395_v20, 1 }
  0x33   : > { %636 = vrot.lane.b32.xlu1 %v2736_v56, %s2609_s11  ;;  %1376 = vmatpush1.bf16.msra.mxu1 %v2524_v42  ;;  %3818 = vst [vmem:[#allocation11_spill] sm:$0xff] %v3017_v35  ;;  %v538_v42 = vrot.slane %v2893_v10, 1  ;;  %v400_v51 = vshrl.u32 %v2965_v62, 16  ;;  %v404_v59 = vrot.slane %v402_v48, 1  ;;  %v407_v61 = vshll.u32 %v2996_v26, 16  ;;  %v233_v9 = vld [vmem:[%s2679_s6 + $0x108] sm:$0xff] }
  0x34   : > { %608 = vrot.lane.b32.xlu0 %v2891_v63, %s2609_s11  ;;  %1568 = vmatprep.subr.bf16.mxu0 %v2946_v43  ;;  %v2542_v10 = vld [vmem:[%s3773_s1 + $0xb0] ss:$8 sps:$4 sm:$0xff]   ;;  %v3043_v7 = vld [vmem:[%s3773_s1 + $0x1b4] ss:$8 sps:$4 sm:$0xff]   ;;  %v3054_v13 = vsel %vm290_vm0, %v393_v38, %v397_v39  ;;  %v232_v18 = vld [vmem:[%s2679_s6 + $0x100] sm:$0x3] }
  0x35   : > { %1377 = vmatprep.subr.bf16.mxu1 %v2527_v54  ;;  %v231_v54 = vld [vmem:[%s2679_s6 + $0xf8] sm:$0xff]  ;;  %3820 = vst [vmem:[#allocation13_spill] sm:$0xff] %v3043_v7  ;;  %3821 = vst [vmem:[#allocation14_spill] sm:$0xff] %v3054_v13  ;;  %v3058_v20 = vsel %vm515_vm1, %v537_v37, %v538_v42  ;;  %v405_v48 = vor.u32 %v404_v59, %v400_v51  ;;  %v2548_v38 = vld [vmem:[%s3773_s1 + $0xc0] ss:$8 sps:$4 sm:$0xff]   ;;  %v3080_v39 = vpack.c.bf16 %v232_v18, %v232_v18 }
  0x36   : > { %1569 = vmatpush1.bf16.msra.mxu0 %v2971_v3  ;;  %3822 = vst [vmem:[#allocation15_spill] sm:$0xff] %v3058_v20  ;;  %v3076_v37 = vld [vmem:[%s3773_s1 + $0x1c4] ss:$8 sps:$4 sm:$0xff]   ;;  %v2551_v51 = vld [vmem:[%s3773_s1 + $0xd4] ss:$8 sps:$4 sm:$0xff]  }
  0x37   : > { %668 = vrot.lane.b32.xlu1 %v2912_v19, %s2609_s11  ;;  %1378 = vmatpush1.bf16.msra.mxu1 %v2530_v4  ;;  %v3034_v4 = vld [vmem:[%s3773_s1 + $0x1a0] ss:$8 sps:$4 sm:$0xff]   ;;  %3824 = vst [vmem:[#allocation17_spill] sm:$0xff] %v3076_v37  ;;  %v235_v18 = vld [vmem:[%s2679_s6 + $0x118] sm:$0x3] }
  0x38   : > { %638 = vrot.lane.b32.xlu0 %v2756_v6, %s2609_s11  ;;  %1570 = vmatprep.subr.bf16.mxu0 %v2980_v5  ;;  %3819 = vst [vmem:[#allocation12_spill] sm:$0xff] %v3034_v4 }
  0x39   : > { %1379 = vmatprep.subr.bf16.mxu1 %v2533_v11  ;;  %v2545_v11 = vld [vmem:[%s3773_s1 + $0xc4] ss:$8 sps:$4 sm:$0xff]  }
  0x3a   : > { %1571 = vmatpush1.bf16.msra.mxu0 %v3003_v30 }
  0x3b   : > { %610 = vrot.lane.b32.xlu1 %v2953_v45, %s2609_s11  ;;  %1380 = vmatpush1.bf16.msra.mxu1 %v2536_v31  ;;  %v409_v31 = vrot.slane %v407_v61, 1  ;;  %v234_v45 = vld [vmem:[%s2679_s6 + $0x110] sm:$0xff] }
  0x3c   : > { %670 = vrot.lane.b32.xlu0 %v2963_v57, %s2609_s11  ;;  %1572 = vmatprep.subr.bf16.mxu0 %v3012_v32  ;;  %v3090_v59 = vpack.c.bf16 %v234_v45, %v233_v9  ;;  %v2554_v45 = vld [vmem:[%s3773_s1 + $0xd0] ss:$8 sps:$4 sm:$0xff]   ;;  %v3112_v9 = vld [vmem:[%s3773_s1 + $0x1d4] ss:$8 sps:$4 sm:$0xff]  }
  0x3d   : > { %1381 = vmatprep.subr.bf16.mxu1 %v2539_v24  ;;  %v3067_v24 = vld [vmem:[%s3773_s1 + $0x1b0] ss:$8 sps:$4 sm:$0xff]   ;;  %v3093_v61 = vsel %vm290_vm0, %v405_v48, %v409_v31  ;;  %3827 = vst [vmem:[#allocation20_spill] sm:$0xff] %v3112_v9  ;;  %v419_v31 = vshll.u32 %v3080_v39, 16 }
  0x3e   : > { %1573 = vmatpush1.bf16.msra.mxu0 %v3034_v4  ;;  %3823 = vst [vmem:[#allocation16_spill] sm:$0xff] %v3067_v24  ;;  %3825 = vst [vmem:[#allocation18_spill] sm:$0xff] %v3093_v61  ;;  %v240_v4 = vld [vmem:[%s2679_s6 + $0x140] sm:$0xff] }
  0x3f   : > { %640 = vrot.lane.b32.xlu1 %v2816_v34, %s2609_s11  ;;  %1382 = vmatpush1.bf16.msra.mxu1 %v2542_v10 }
  0x40   : > { %612 = vrot.lane.b32.xlu0 %v2994_v25, %s2609_s11  ;;  %v3060_v25 = vpack.c.bf16 %v231_v54, %v230_v53  ;;  %1574 = vmatprep.subr.bf16.mxu0 %v3043_v7  ;;  %v540_v53 = vrot.slane %v2925_v33, 1  ;;  %v541_v54 = vrot.slane %v2955_v49, 1  ;;  %v426_v49 = vshll.u32 %v3090_v59, 16  ;;  %v239_v7 = vld [vmem:[%s2679_s6 + $0x138] sm:$0xff] }
  0x41   : > { %1383 = vmatprep.subr.bf16.mxu1 %v2545_v11  ;;  %v236_v11 = vld [vmem:[%s2679_s6 + $0x120] sm:$0xff] }
  0x42   : > { %v414_v42 = vshll.u32 %v3060_v25, 16  ;;  %v412_v10 = vshrl.u32 %v3060_v25, 16  ;;  %1575 = vmatpush1.bf16.msra.mxu0 %v3067_v24  ;;  %v3126_v24 = vpack.c.bf16 %v235_v18, %v235_v18  ;;  %v421_v18 = vrot.slane %v419_v31, 1  ;;  %v243_v31 = vld [vmem:[%s2679_s6 + $0x158] sm:$0xff] }
  0x43   : > { %672 = vrot.lane.b32.xlu1 %v3017_v35, %s2609_s11  ;;  %1384 = vmatpush1.bf16.msra.mxu1 %v2548_v38  ;;  %v2557_v38 = vld [vmem:[%s3773_s1 + $0xe4] ss:$8 sps:$4 sm:$0xff]   ;;  %v428_v32 = vrot.slane %v426_v49, 1  ;;  %v3169_v49 = vld [vmem:[%s3773_s1 + $0x1e0] ss:$8 sps:$4 sm:$0xff]  }
  0x44   : > { %642 = vrot.lane.b32.xlu0 %v2860_v55, %s2609_s11  ;;  %1576 = vmatprep.subr.bf16.mxu0 %v3076_v37  ;;  %v416_v48 = vrot.slane %v414_v42, 1  ;;  %v3124_v37 = vsel %vm515_vm1, %v540_v53, %v541_v54  ;;  %v3135_v42 = vld [vmem:[%s3773_s1 + $0x1d0] ss:$8 sps:$4 sm:$0xff]   ;;  %v3146_v53 = vld [vmem:[%s3773_s1 + $0x1e4] ss:$8 sps:$4 sm:$0xff]   ;;  %3831 = vst [vmem:[#allocation24_spill] sm:$0xff] %v3169_v49 }
  0x45   : > { %1385 = vmatprep.subr.bf16.mxu1 %v2551_v51  ;;  %3828 = vst [vmem:[#allocation21_spill] sm:$0xff] %v3124_v37  ;;  %3829 = vst [vmem:[#allocation22_spill] sm:$0xff] %v3135_v42  ;;  %v2560_v51 = vld [vmem:[%s3773_s1 + $0xe0] ss:$8 sps:$4 sm:$0xff]  }
  0x46   : > { %3830 = vst [vmem:[#allocation23_spill] sm:$0xff] %v3146_v53  ;;  %v417_v54 = vor.u32 %v416_v48, %v412_v10  ;;  %v241_v10 = vld [vmem:[%s2679_s6 + $0x148] sm:$0x3]  ;;  %v3162_v48 = vpack.c.bf16 %v240_v4, %v239_v7  ;;  %v3178_v4 = vld [vmem:[%s3773_s1 + $0x1f4] ss:$8 sps:$4 sm:$0xff]  }
  0x47   : > { %614 = vrot.lane.b32.xlu1 %v3054_v13, %s2609_s11  ;;  %v3102_v13 = vld [vmem:[%s3773_s1 + $0x1c0] ss:$8 sps:$4 sm:$0xff]   ;;  %1386 = vmatpush1.bf16.msra.mxu1 %v2554_v45  ;;  %3832 = vst [vmem:[#allocation25_spill] sm:$0xff] %v3178_v4 }
  0x48   : > { %674 = vrot.lane.b32.xlu0 %v3058_v20, %s2609_s11  ;;  %3826 = vst [vmem:[#allocation19_spill] sm:$0xff] %v3102_v13  ;;  %v237_v20 = vld [vmem:[%s2679_s6 + $0x128] sm:$0xff]  ;;  %1577 = vmatpush1.bf16.msra.mxu0 %v3102_v13  ;;  %v424_v13 = vshrl.u32 %v3090_v59, 16  ;;  %v3183_v7 = vsel %vm290_vm0, %v417_v54, %v421_v18 }
  0x49   : > { %1578 = vmatprep.subr.bf16.mxu0 %v3112_v9  ;;  %1387 = vmatprep.subr.bf16.mxu1 %v2557_v38  ;;  %3833 = vst [vmem:[#allocation26_spill] sm:$0xff] %v3183_v7 }
  0x4a   : > { %v429_v38 = vor.u32 %v428_v32, %v424_v13  ;;  %v244_v32 = vld [vmem:[%s2679_s6 + $0x160] sm:$0x3]  ;;  %v3199_v13 = vld [vmem:[%s3773_s1 + $0x1f0] ss:$8 sps:$4 sm:$0xff]  }
  0x4b   : > { %644 = vrot.lane.b32.xlu1 %v2925_v33, %s2609_s11  ;;  %v238_v33 = vld [vmem:[%s2679_s6 + $0x130] sm:$0x3]  ;;  %1388 = vmatpush1.bf16.msra.mxu1 %v2560_v51  ;;  %v3185_v51 = vpack.c.bf16 %v241_v10, %v241_v10 }
  0x4c   : > { %616 = vrot.lane.b32.xlu0 %v3093_v61, %s2609_s11  ;;  %v3140_v61 = vpack.c.bf16 %v237_v20, %v236_v11  ;;  %v2563_v20 = vld [vmem:[%s3773_s1 + $0xf4] ss:$8 sps:$4 sm:$0xff]   ;;  %v431_v11 = vshll.u32 %v3126_v24, 16  ;;  %v3157_v45 = vpack.c.bf16 %v238_v33, %v238_v33  ;;  %1579 = vmatpush1.bf16.msra.mxu0 %v3135_v42  ;;  %v2566_v33 = vld [vmem:[%s3773_s1 + $0xf0] ss:$8 sps:$4 sm:$0xff]  }
  0x4d   : > { %1580 = vmatprep.subr.bf16.mxu0 %v3146_v53  ;;  %v450_v53 = vshll.u32 %v3162_v48, 16  ;;  %1389 = vmatprep.subr.bf16.mxu1 %v2563_v20  ;;  %v455_v18 = vshll.u32 %v3185_v51, 16  ;;  %v245_v20 = vld [vmem:[%s2679_s6 + $0x168] sm:$0xff] }
  0x4e   : > { %v438_v9 = vshll.u32 %v3140_v61, 16  ;;  %v433_v42 = vrot.slane %v431_v11, 1  ;;  %v436_v35 = vshrl.u32 %v3140_v61, 16  ;;  %v443_v5 = vshll.u32 %v3157_v45, 16  ;;  %v246_v11 = vld [vmem:[%s2679_s6 + $0x170] sm:$0xff] }
  0x4f   : > { %676 = vrot.lane.b32.xlu1 %v3124_v37, %s2609_s11  ;;  %v242_v37 = vld [vmem:[%s2679_s6 + $0x150] sm:$0xff]  ;;  %1390 = vmatpush1.bf16.msra.mxu1 %v2566_v33  ;;  %v452_v54 = vrot.slane %v450_v53, 1  ;;  %v247_v53 = vld [vmem:[%s2679_s6 + $0x178] sm:$0x3]  ;;  %v457_v55 = vrot.slane %v455_v18, 1 }
  0x50   : > { %646 = vrot.lane.b32.xlu0 %v2965_v62, %s2609_s11  ;;  %v440_v30 = vrot.slane %v438_v9, 1  ;;  %v3192_v3 = vpack.c.bf16 %v243_v31, %v242_v37  ;;  %1581 = vmatpush1.bf16.msra.mxu0 %v3169_v49  ;;  %v2572_v9 = vld [vmem:[%s3773_s1 + $0x204] ss:$8 sps:$4 sm:$0xff]   ;;  %v448_v37 = vshrl.u32 %v3162_v48, 16  ;;  %v3216_v31 = vsel %vm290_vm0, %v429_v38, %v433_v42 }
  0x51   : > { %1582 = vmatprep.subr.bf16.mxu0 %v3178_v4  ;;  %2223 = vmatprep.subr.bf16.mxu1 %v2660_v2  ;;  %3834 = vst [vmem:[#allocation27_spill] sm:$0xff] %v3216_v31  ;;  %v445_v4 = vrot.slane %v443_v5, 1  ;;  %v3222_v49 = vpack.c.bf16 %v246_v11, %v245_v20  ;;  %v248_v20 = vld [vmem:[%s2679_s6 + $0x180] sm:$0xff]  ;;  %v249_v11 = vld [vmem:[%s2679_s6 + $0x188] sm:$0xff] }
  0x52   : > { %v462_v10 = vshll.u32 %v3192_v3, 16  ;;  %v441_v33 = vor.u32 %v440_v30, %v436_v35  ;;  %v453_v2 = vor.u32 %v452_v54, %v448_v37  ;;  %v460_v63 = vshrl.u32 %v3192_v3, 16 }
  0x53   : > { %648 = vrot.lane.b32.xlu1 %v3060_v25, %s2609_s11  ;;  %v3233_v35 = vpack.c.bf16 %v247_v53, %v247_v53  ;;  %v474_v38 = vshll.u32 %v3222_v49, 16  ;;  %v472_v37 = vshrl.u32 %v3222_v49, 16 }
  0x54   : > { %650 = vrot.lane.b32.xlu0 %v3090_v59, %s2609_s11  ;;  %1583 = vmatpush1.bf16.msra.mxu0 %v3199_v13  ;;  %v464_v42 = vrot.slane %v462_v10, 1  ;;  %v3230_v5 = vsel %vm290_vm0, %v441_v33, %v445_v4  ;;  %v3256_v33 = vpack.c.bf16 %v249_v11, %v248_v20 }
  0x55   : > { %1745 = vmatprep.subr.bf16.mxu0 %v2572_v9  ;;  %3835 = vst [vmem:[#allocation28_spill] sm:$0xff] %v3230_v5  ;;  %v476_v54 = vrot.slane %v474_v38, 1  ;;  %v479_v18 = vshll.u32 %v3233_v35, 16  ;;  %v252_v38 = vld [vmem:[%s2679_s6 + $0x1a0] sm:$0xff] }
  0x56   : > { %v465_v9 = vor.u32 %v464_v42, %v460_v63  ;;  %v544_v63 = vrot.slane %v2996_v26, 1  ;;  %v250_v42 = vld [vmem:[%s2679_s6 + $0x190] sm:$0x3]  ;;  %v547_v26 = vrot.slane %v3080_v39, 1 }
  0x57   : > { %618 = vrot.lane.b32.xlu1 %v3183_v7, %s2609_s11  ;;  %v3218_v7 = vpack.c.bf16 %v244_v32, %v244_v32  ;;  %v3239_v32 = vsel %vm290_vm0, %v453_v2, %v457_v55  ;;  %v543_v55 = vrot.slane %v2965_v62, 1  ;;  %v477_v53 = vor.u32 %v476_v54, %v472_v37 }
  0x58   : > { %652 = vrot.lane.b32.xlu0 %v3140_v61, %s2609_s11  ;;  %3836 = vst [vmem:[#allocation29_spill] sm:$0xff] %v3239_v32  ;;  %v481_v2 = vrot.slane %v479_v18, 1  ;;  %v567_v37 = vshll.u32 %v3256_v33, 16  ;;  %v549_v54 = vrot.slane %v3090_v59, 1  ;;  %v550_v18 = vrot.slane %v3126_v24, 1 }
  0x59   : > { %v467_v30 = vshll.u32 %v3218_v7, 16  ;;  %v287_v20 = vpack.c.bf16 %v250_v42, %v250_v42  ;;  %v556_v24 = vrot.slane %v3185_v51, 1 }
  0x5a   : > { %v569_v42 = vrot.slane %v567_v37, 1  ;;  %v558_v37 = vrot.slane %v3192_v3, 1 }
  0x5b   : > { %620 = vrot.lane.b32.xlu1 %v3216_v31, %s2609_s11  ;;  %v469_v4 = vrot.slane %v467_v30, 1  ;;  %v251_v30 = vld [vmem:[%s2679_s6 + $0x198] sm:$0xff] }
  0x5c   : > { %654 = vrot.lane.b32.xlu0 %v3162_v48, %s2609_s11  ;;  %v3276_v11 = vpack.c.bf16 %v252_v38, %v251_v30  ;;  %v3292_v30 = vsel %vm515_vm1, %v549_v54, %v550_v18  ;;  %v572_v38 = vshll.u32 %v287_v20, 16  ;;  %v559_v54 = vrot.slane %v3218_v7, 1 }
  0x5d   : > { %v3254_v10 = vsel %vm290_vm0, %v465_v9, %v469_v4  ;;  %v3268_v9 = vsel %vm290_vm0, %v477_v53, %v481_v2  ;;  %v3271_v4 = vsel %vm515_vm1, %v543_v55, %v544_v63  ;;  %v552_v53 = vrot.slane %v3140_v61, 1 }
  0x5e   : > { %3837 = vst [vmem:[#allocation30_spill] sm:$0xff] %v3254_v10  ;;  %3838 = vst [vmem:[#allocation31_spill] sm:$0xff] %v3268_v9  ;;  %v553_v55 = vrot.slane %v3157_v45, 1  ;;  %v555_v63 = vrot.slane %v3162_v48, 1  ;;  %v565_v2 = vshrl.u32 %v3256_v33, 16  ;;  %v574_v18 = vrot.slane %v572_v38, 1 }
  0x5f   : > { %622 = vrot.lane.b32.xlu1 %v3230_v5, %s2609_s11  ;;  %v562_v7 = vrot.slane %v3233_v35, 1  ;;  %v578_v38 = vrot.slane %v3256_v33, 1  ;;  %v517_v35 = vrot.slane %v2706_v22, 1  ;;  %v2570_v22 = vld [vmem:[%s3773_s1 + $0x200] ss:$8 sps:$4 sm:$0xff]  }
  0x60   : > { %656 = vrot.lane.b32.xlu0 %v3192_v3, %s2609_s11  ;;  %v3300_v45 = vsel %vm515_vm1, %v552_v53, %v553_v55  ;;  %v3305_v51 = vsel %vm515_vm1, %v555_v63, %v556_v24  ;;  %v3316_v53 = vsel %vm515_vm1, %v558_v37, %v559_v54  ;;  %v561_v55 = vrot.slane %v3222_v49, 1 }
  0x63   : > { %624 = vrot.lane.b32.xlu1 %v3239_v32, %s2609_s11  ;;  %v546_v32 = vrot.slane %v3060_v25, 1 }
  0x64   : > { %658 = vrot.lane.b32.xlu0 %v3222_v49, %s2609_s11 }
  0x65   : > { %v3282_v39 = vsel %vm515_vm1, %v546_v32, %v547_v26  ;;  %v584_v26 = vshll.u32 %v3276_v11, 16 }
  0x67   : > { %626 = vrot.lane.b32.xlu1 %v3254_v10, %s2609_s11  ;;  %v253_v10 = vld [vmem:[%s2679_s6 + $0x1a8] sm:$0x3]  ;;  %v586_v5 = vrot.slane %v584_v26, 1  ;;  %v579_v26 = vrot.slane %v287_v20, 1 }
  0x68   : > { %660 = vrot.lane.b32.xlu0 %v3256_v33, %s2609_s11  ;;  %v3294_v32 = vpack.c.bf16 %v253_v10, %v253_v10  ;;  %v570_v10 = vor.u32 %v569_v42, %v565_v2  ;;  %v3328_v42 = vsel %vm515_vm1, %v561_v55, %v562_v7 }
  0x6a   : > { %v589_v31 = vshll.u32 %v3294_v32, 16  ;;  %v3321_v63 = vsel %vm290_vm0, %v570_v10, %v574_v18 }
  0x6b   : > { %628 = vrot.lane.b32.xlu1 %v3268_v9, %s2609_s11  ;;  %v582_v9 = vshrl.u32 %v3276_v11, 16 }
  0x6c   : > { %678 = vrot.lane.b32.xlu0 %v3271_v4, %s2609_s11  ;;  %v591_v2 = vrot.slane %v589_v31, 1  ;;  %v3336_v31 = vsel %vm515_vm1, %v578_v38, %v579_v26  ;;  %v2575_v38 = vld [vmem:[%s3773_s1 + $0x214] ss:$8 sps:$4 sm:$0xff]  }
  0x6d   : > { %v587_v24 = vor.u32 %v586_v5, %v582_v9  ;;  %v516_v5 = vrot.slane %v2704_v21, 1  ;;  %v2583_v26 = vld [vmem:[%s3773_s1 + $0x114] ss:$8 sps:$4 sm:$0xff]  }
  0x6f   : > { %680 = vrot.lane.b32.xlu1 %v3282_v39, %s2609_s11  ;;  %v592_v37 = vsel %vm290_vm0, %v587_v24, %v591_v2  ;;  %v518_v9 = vsel %vm515_vm1, %v516_v5, %v517_v35  ;;  %v2582_v2 = vld [vmem:[%s3773_s1 + $0x100] ss:$8 sps:$4 sm:$0xff]   ;;  %v2584_v35 = vld [vmem:[%s3773_s1 + $0x110] ss:$8 sps:$4 sm:$0xff]  }
  0x70   : > { %682 = vrot.lane.b32.xlu0 %v3292_v30, %s2609_s11 }
  0x73   : > { %684 = vrot.lane.b32.xlu1 %v3300_v45, %s2609_s11 }
  0x74   : > { %686 = vrot.lane.b32.xlu0 %v3305_v51, %s2609_s11 }
  0x77   : > { %688 = vrot.lane.b32.xlu1 %v3316_v53, %s2609_s11 }
  0x78   : > { %694 = vrot.lane.b32.xlu0 %v3321_v63, %s2609_s11 }
  0x7b   : > { %690 = vrot.lane.b32.xlu1 %v3328_v42, %s2609_s11 }
  0x7c   : > { %696 = vrot.lane.b32.xlu0 %v592_v37, %s2609_s11 }
  0x7f   : > { %692 = vrot.lane.b32.xlu1 %v3336_v31, %s2609_s11 }
  0x89   : > { %v631_v20 = vpop.permute.xlu0 %630 }
  0x8a   : > { %v749_v54 = vsel %vm698_vm2, %v518_v9, %v631_v20 }
  0x8b   : > { %1391 = vmatprep.mubr.bf16.mxu1 %v749_v54 }
  0x91   : > { %v603_v10 = vpop.permute.xlu1 %602 }
  0x92   : > { %v599_v18 = vpop.permute.xlu0 %598  ;;  %v706_v55 = vsel %vm698_vm2, %v2695_v16, %v603_v10 }
  0x93   : > { %v700_v7 = vsel %vm698_vm2, %v2704_v21, %v599_v18  ;;  %1584 = vmatprep.mubr.bf16.mxu0 %v706_v55 }
  0x94   : > { %1392 = vmatmul.mubr.bf16.vlgmr.msra.gmra.mrb[0].mxu1 %v700_v7 }
  0x95   : > { %v663_v24 = vpop.permute.xlu1 %662  ;;  %2239 = vmatpush1.bf16.msra.mxu1 %v2582_v2 }
  0x96   : > { %v813_v16 = vsel %vm698_vm2, %v2779_v15, %v663_v24  ;;  %v633_v21 = vpop.permute.xlu0 %632  ;;  %2224 = vmatprep.subr.bf16.mxu1 %v2583_v26  ;;  %v2573_v15 = vld [vmem:[%s3773_s1 + $0x210] ss:$8 sps:$4 sm:$0xff]  }
  0x97   : > { %1585 = vmatmul.mubr.bf16.vlgmr.msra.gmra.mrb[0].mxu0 %v813_v16  ;;  %v753_v37 = vsel %vm698_vm2, %v2745_v60, %v633_v21  ;;  %v2578_v60 = vld [vmem:[%s3773_s1 + $0x224] ss:$8 sps:$4 sm:$0xff]  }
  0x98   : > { %1746 = vmatpush1.bf16.msra.mxu0 %v2570_v22  ;;  %1401 = vmatprep.mubr.bf16.mxu1 %v753_v37  ;;  %v3841_v37 = vld [vmem:[#allocation6_spill] sm:$0xff] }
  0x99   : > { %v601_v5 = vpop.permute.xlu1 %600  ;;  %2240 = vmatpush1.bf16.msra.mxu1 %v2584_v35  ;;  %1747 = vmatprep.subr.bf16.mxu0 %v2575_v38 }
  0x9a   : > { %v703_v9 = vsel %vm698_vm2, %v2690_v12, %v601_v5  ;;  %v605_v20 = vpop.permute.xlu0 %604  ;;  %2225 = vmatprep.subr.bf16.mxu1 %v2752_v0  ;;  %v2576_v12 = vld [vmem:[%s3773_s1 + $0x220] ss:$8 sps:$4 sm:$0xff]  }
  0x9b   : > { %v709_v54 = vsel %vm698_vm2, %v2720_v41, %v605_v20  ;;  %v2581_v41 = vld [vmem:[%s3773_s1 + $0x234] ss:$8 sps:$4 sm:$0xff]   ;;  %v3842_v5 = vld [vmem:[#allocation7_spill] sm:$0xff]  ;;  %v3845_v20 = vld [vmem:[#allocation10_spill] sm:$0xff] }
  0x9c   : > { %1402 = vmatmul.mubr.bf16.gmra.mrb[4].mxu1 %v703_v9  ;;  %1594 = vmatprep.mubr.bf16.mxu0 %v709_v54 }
  0x9d   : > { %v665_v10 = vpop.permute.xlu1 %664  ;;  %2241 = vmatpush1.bf16.msra.mxu1 %v2765_v8  ;;  %1748 = vmatpush1.bf16.msra.mxu0 %v2573_v15  ;;  %v3843_v15 = vld [vmem:[#allocation9_spill] sm:$0xff] }
  0x9e   : > { %v817_v0 = vsel %vm698_vm2, %v2730_v52, %v665_v10  ;;  %v635_v18 = vpop.permute.xlu0 %634  ;;  %2226 = vmatprep.subr.bf16.mxu1 %v2786_v17  ;;  %1749 = vmatprep.subr.bf16.mxu0 %v2578_v60  ;;  %v2579_v52 = vld [vmem:[%s3773_s1 + $0x230] ss:$8 sps:$4 sm:$0xff]  }
  0x9f   : > { %1595 = vmatmul.mubr.bf16.gmra.mrb[4].mxu0 %v817_v0  ;;  %v757_v8 = vsel %vm698_vm2, %v2810_v29, %v635_v18  ;;  %v3846_v60 = vld [vmem:[#allocation5_spill] sm:$0xff]  ;;  %v3848_v18 = vld [vmem:[#allocation12_spill] sm:$0xff] }
  0xa0   : > { %1411 = vmatprep.mubr.bf16.mxu1 %v757_v8 }
  0xa1   : > { %v607_v7 = vpop.permute.xlu1 %606  ;;  %2242 = vmatpush1.bf16.msra.mxu1 %v2801_v27  ;;  %1750 = vmatpush1.bf16.msra.mxu0 %v2576_v12  ;;  %v3847_v12 = vld [vmem:[#allocation4_spill] sm:$0xff] }
  0xa2   : > { %v667_v22 = vpop.permute.xlu0 %666  ;;  %v712_v17 = vsel %vm698_vm2, %v2736_v56, %v607_v7  ;;  %2227 = vmatprep.subr.bf16.mxu1 %v2822_v36  ;;  %1751 = vmatprep.subr.bf16.mxu0 %v2581_v41  ;;  %v3849_v41 = vld [vmem:[#allocation13_spill] sm:$0xff] }
  0xa3   : > { %1604 = vmatprep.mubr.bf16.mxu0 %v712_v17  ;;  %v821_v24 = vsel %vm698_vm2, %v2789_v23, %v667_v22  ;;  %v3851_v22 = vld [vmem:[#allocation15_spill] sm:$0xff] }
  0xa4   : > { %1412 = vmatmul.mubr.bf16.gmra.mrb[8].mxu1 %v706_v55 }
  0xa5   : > { %v637_v2 = vpop.permute.xlu1 %636  ;;  %2243 = vmatpush1.bf16.msra.mxu1 %v2838_v44  ;;  %1752 = vmatpush1.bf16.msra.mxu0 %v2579_v52  ;;  %v3850_v52 = vld [vmem:[#allocation16_spill] sm:$0xff] }
  0xa6   : > { %v761_v27 = vsel %vm698_vm2, %v2857_v50, %v637_v2  ;;  %v609_v38 = vpop.permute.xlu0 %608  ;;  %2228 = vmatprep.subr.bf16.mxu1 %v2846_v46  ;;  %v3853_v2 = vld [vmem:[#allocation8_spill] sm:$0xff] }
  0xa7   : > { %1605 = vmatmul.mubr.bf16.gmra.mrb[8].mxu0 %v821_v24  ;;  %1421 = vmatprep.mubr.bf16.mxu1 %v761_v27  ;;  %v715_v56 = vsel %vm698_vm2, %v2756_v6, %v609_v38  ;;  %v3852_v24 = vld [vmem:[#allocation17_spill] sm:$0xff] }
  0xa8   : > { %1614 = vmatprep.mubr.bf16.mxu0 %v715_v56 }
  0xa9   : > { %v669_v36 = vpop.permute.xlu1 %668  ;;  %2244 = vmatpush1.bf16.msra.mxu1 %v2869_v58 }
  0xaa   : > { %v639_v23 = vpop.permute.xlu0 %638  ;;  %2229 = vmatprep.subr.bf16.mxu1 %v2882_v1  ;;  %v825_v55 = vsel %vm698_vm2, %v2851_v47, %v669_v36  ;;  %v3839_v47 = vld [vmem:[#allocation3_spill] sm:$0xff]  ;;  %v3855_v36 = vld [vmem:[#allocation20_spill] sm:$0xff] }
  0xab   : > { %v765_v44 = vsel %vm698_vm2, %v2912_v19, %v639_v23 }
  0xac   : > { %1422 = vmatmul.mubr.bf16.gmra.mrb[12].mxu1 %v709_v54 }
  0xad   : > { %1431 = vmatprep.mubr.bf16.mxu1 %v765_v44  ;;  %v611_v46 = vpop.permute.xlu1 %610  ;;  %2245 = vmatpush1.bf16.msra.mxu1 %v2903_v14 }
  0xae   : > { %v671_v16 = vpop.permute.xlu0 %670  ;;  %v718_v6 = vsel %vm698_vm2, %v2816_v34, %v611_v46  ;;  %2230 = vmatprep.subr.bf16.mxu1 %v2920_v28  ;;  %v3840_v34 = vld [vmem:[#allocation2_spill] sm:$0xff]  ;;  %v3857_v46 = vld [vmem:[#allocation21_spill] sm:$0xff] }
  0xaf   : > { %1615 = vmatmul.mubr.bf16.gmra.mrb[12].mxu0 %v825_v55  ;;  %v829_v14 = vsel %vm698_vm2, %v3839_v47, %v671_v16  ;;  %v3856_v55 = vld [vmem:[#allocation22_spill] sm:$0xff] }
  0xb0   : > { %1624 = vmatprep.mubr.bf16.mxu0 %v718_v6 }
  0xb1   : > { %v641_v58 = vpop.permute.xlu1 %640  ;;  %2246 = vmatpush1.bf16.msra.mxu1 %v2937_v40 }
  0xb2   : > { %v769_v1 = vsel %vm698_vm2, %v2963_v57, %v641_v58  ;;  %v613_v21 = vpop.permute.xlu0 %612  ;;  %2231 = vmatprep.subr.bf16.mxu1 %v2946_v43  ;;  %v3844_v43 = vld [vmem:[#allocation11_spill] sm:$0xff]  ;;  %v3859_v58 = vld [vmem:[#allocation14_spill] sm:$0xff] }
  0xb3   : > { %v721_v28 = vsel %vm698_vm2, %v3840_v34, %v613_v21  ;;  %v3861_v21 = vld [vmem:[#allocation25_spill] sm:$0xff] }
  0xb4   : > { %1432 = vmatmul.mubr.bf16.gmra.mrb[16].mxu1 %v712_v17 }
  0xb5   : > { %1441 = vmatprep.mubr.bf16.mxu1 %v769_v1  ;;  %v673_v26 = vpop.permute.xlu1 %672  ;;  %2247 = vmatpush1.bf16.msra.mxu1 %v3841_v37 }
  0xb6   : > { %2232 = vmatprep.subr.bf16.mxu1 %v3842_v5  ;;  %v643_v40 = vpop.permute.xlu0 %642  ;;  %v833_v54 = vsel %vm698_vm2, %v3846_v60, %v673_v26 }
  0xb7   : > { %1625 = vmatmul.mubr.bf16.gmra.mrb[16].mxu0 %v829_v14  ;;  %v773_v9 = vsel %vm698_vm2, %v3844_v43, %v643_v40  ;;  %v2610_v14 = vmov 0  }
  0xb8   : > { %1634 = vmatprep.mubr.bf16.mxu0 %v721_v28 }
  0xb9   : > { %v615_v35 = vpop.permute.xlu1 %614  ;;  %2248 = vmatpush1.bf16.msra.mxu1 %v3843_v15 }
  0xba   : > { %2233 = vmatprep.subr.bf16.mxu1 %v3845_v20  ;;  %v675_v10 = vpop.permute.xlu0 %674  ;;  %v724_v0 = vsel %vm698_vm2, %v3847_v12, %v615_v35 }
  0xbb   : > { %v837_v27 = vsel %vm698_vm2, %v3853_v2, %v675_v10 }
  0xbc   : > { %1442 = vmatmul.mubr.bf16.gmra.mrb[20].mxu1 %v715_v56  ;;  %v3854_v56 = vld [vmem:[#allocation19_spill] sm:$0xff] }
  0xbd   : > { %1451 = vmatprep.mubr.bf16.mxu1 %v773_v9  ;;  %2249 = vmatpush1.bf16.msra.mxu1 %v3848_v18  ;;  %v645_v8 = vpop.permute.xlu1 %644 }
  0xbe   : > { %2234 = vmatprep.subr.bf16.mxu1 %v3849_v41  ;;  %v617_v7 = vpop.permute.xlu0 %616  ;;  %v777_v17 = vsel %vm698_vm2, %v3851_v22, %v645_v8 }
  0xbf   : > { %1635 = vmatmul.mubr.bf16.gmra.mrb[20].mxu0 %v833_v54  ;;  %v727_v38 = vsel %vm698_vm2, %v2965_v62, %v617_v7  ;;  %v3860_v62 = vld [vmem:[#allocation24_spill] sm:$0xff] }
  0xc0   : > { %1644 = vmatprep.mubr.bf16.mxu0 %v724_v0 }
  0xc1   : > { %2250 = vmatpush1.bf16.msra.mxu1 %v3850_v52  ;;  %v677_v44 = vpop.permute.xlu1 %676 }
  0xc2   : > { %2235 = vmatprep.subr.bf16.mxu1 %v3852_v24  ;;  %v647_v23 = vpop.permute.xlu0 %646  ;;  %v841_v1 = vsel %vm698_vm2, %v3859_v58, %v677_v44 }
  0xc3   : > { %v781_v16 = vsel %vm698_vm2, %v3857_v46, %v647_v23 }
  0xc4   : > { %1452 = vmatmul.mubr.bf16.gmra.mrb[24].mxu1 %v718_v6  ;;  %v3858_v6 = vld [vmem:[#allocation23_spill] sm:$0xff] }
  0xc5   : > { %1461 = vmatprep.mubr.bf16.mxu1 %v777_v17  ;;  %2251 = vmatpush1.bf16.msra.mxu1 %v3854_v56  ;;  %v649_v47 = vpop.permute.xlu1 %648  ;;  %v3867_v56 = vld [vmem:[#allocation30_spill] sm:$0xff] }
  0xc6   : > { %2236 = vmatprep.subr.bf16.mxu1 %v3855_v36  ;;  %v785_v26 = vsel %vm698_vm2, %v3271_v4, %v649_v47  ;;  %v651_v34 = vpop.permute.xlu0 %650 }
  0xc7   : > { %1645 = vmatmul.mubr.bf16.gmra.mrb[24].mxu0 %v837_v27 }
  0xc8   : > { %1654 = vmatprep.mubr.bf16.mxu0 %v727_v38 }
  0xc9   : > { %2252 = vmatpush1.bf16.msra.mxu1 %v3856_v55  ;;  %v619_v37 = vpop.permute.xlu1 %618  ;;  %v3868_v55 = vld [vmem:[#allocation31_spill] sm:$0xff] }
  0xca   : > { %2237 = vmatprep.subr.bf16.mxu1 %v3858_v6  ;;  %v730_v5 = vsel %vm698_vm2, %v3060_v25, %v619_v37 }
  0xcc   : > { %1462 = vmatmul.mubr.bf16.gmra.mrb[28].mxu1 %v721_v28  ;;  %v789_v28 = vsel %vm698_vm2, %v3282_v39, %v651_v34 }
  0xcd   : > { %1471 = vmatprep.mubr.bf16.mxu1 %v781_v16  ;;  %2253 = vmatpush1.bf16.msra.mxu1 %v3860_v62  ;;  %v621_v40 = vpop.permute.xlu1 %620 }
  0xce   : > { %2238 = vmatprep.subr.bf16.mxu1 %v3861_v21 }
  0xcf   : > { %1655 = vmatmul.mubr.bf16.gmra.mrb[28].mxu0 %v841_v1 }
  0xd0   : > { %1777 = vmatprep.mubr.bf16.mxu0 %v2610_v14 }
  0xd1   : > { %2254 = vmatpush1.bf16.msra.mxu1 %v3199_v13  ;;  %v653_v13 = vpop.permute.xlu0 %652  ;;  %v623_v25 = vpop.permute.xlu1 %622 }
  0xd4   : > { %1472 = vmatmul.mubr.bf16.gmra.mrb[32].mxu1 %v724_v0 }
  0xd5   : > { %1481 = vmatprep.mubr.bf16.mxu1 %v785_v26  ;;  %v655_v35 = vpop.permute.xlu0 %654 }
  0xd6   : > { %v797_v15 = vsel %vm698_vm2, %v3300_v45, %v655_v35 }
  0xd7   : > { %2172 = vmatmul.mubr.msk.bf16.vlgmr.msra.gmra.mrb[0].mxu0 %vm698_vm2, %v2810_v29  ;;  %v793_v29 = vsel %vm698_vm2, %v3292_v30, %v653_v13 }
  0xd8   : > { %1787 = vmatprep.mubr.bf16.mxu0 %v2610_v14 }
  0xd9   : > { %v657_v9 = vpop.permute.xlu0 %656 }
  0xda   : > { %v801_v20 = vsel %vm698_vm2, %v3305_v51, %v657_v9 }
  0xdc   : > { %1482 = vmatmul.mubr.bf16.gmra.mrb[36].mxu1 %v727_v38 }
  0xdd   : > { %1491 = vmatprep.mubr.bf16.mxu1 %v789_v28  ;;  %v659_v60 = vpop.permute.xlu0 %658 }
  0xde   : > { %v805_v54 = vsel %vm698_vm2, %v3316_v53, %v659_v60 }
  0xdf   : > { %2173 = vmatmul.mubr.msk.bf16.gmra.mrb[4].mxu0 %vm698_vm2, %v2857_v50  ;;  %v733_v50 = vsel %vm698_vm2, %v3090_v59, %v621_v40  ;;  %v625_v59 = vpop.permute.xlu1 %624 }
  0xe0   : > { %1797 = vmatprep.mubr.bf16.mxu0 %v2610_v14 }
  0xe1   : > { %v661_v10 = vpop.permute.xlu0 %660 }
  0xe2   : > { %v809_v12 = vsel %vm698_vm2, %v3328_v42, %v661_v10 }
  0xe4   : > { %1492 = vmatmul.mubr.bf16.gmra.mrb[40].mxu1 %v730_v5 }
  0xe5   : > { %1501 = vmatprep.mubr.bf16.mxu1 %v793_v29  ;;  %v679_v18 = vpop.permute.xlu0 %678 }
  0xe7   : > { %2174 = vmatmul.mubr.msk.bf16.gmra.mrb[8].mxu0 %vm698_vm2, %v2912_v19  ;;  %v736_v19 = vsel %vm698_vm2, %v3140_v61, %v623_v25  ;;  %v627_v61 = vpop.permute.xlu1 %626 }
  0xe8   : > { %1807 = vmatprep.mubr.bf16.mxu0 %v2610_v14 }
  0xe9   : > { %v683_v52 = vpop.permute.xlu0 %682 }
  0xec   : > { %1502 = vmatmul.mubr.bf16.gmra.mrb[44].mxu1 %v733_v50 }
  0xed   : > { %1511 = vmatprep.mubr.bf16.mxu1 %v797_v15  ;;  %v687_v2 = vpop.permute.xlu0 %686 }
  0xef   : > { %2175 = vmatmul.mubr.msk.bf16.gmra.mrb[12].mxu0 %vm698_vm2, %v2963_v57  ;;  %v739_v57 = vsel %vm698_vm2, %v3162_v48, %v625_v59  ;;  %v629_v48 = vpop.permute.xlu1 %628 }
  0xf0   : > { %1817 = vmatprep.mubr.bf16.mxu0 %v2610_v14  ;;  %v745_v0 = vsel %vm698_vm2, %v3222_v49, %v629_v48  ;;  %v3863_v49 = vld [vmem:[#allocation26_spill] sm:$0xff] }
  0xf3   : > { %v681_v8 = vpop.permute.xlu1 %680 }
  0xf4   : > { %1512 = vmatmul.mubr.bf16.gmra.mrb[48].mxu1 %v736_v19  ;;  %v849_v7 = vsel %vm698_vm2, %v3863_v49, %v681_v8 }
  0xf5   : > { %1521 = vmatprep.mubr.bf16.mxu1 %v801_v20 }
  0xf7   : > { %2176 = vmatmul.mubr.msk.bf16.gmra.mrb[16].mxu0 %vm698_vm2, %v3844_v43  ;;  %v742_v43 = vsel %vm698_vm2, %v3192_v3, %v627_v61  ;;  %v3862_v3 = vld [vmem:[#allocation18_spill] sm:$0xff]  ;;  %v685_v17 = vpop.permute.xlu1 %684 }
  0xf8   : > { %1827 = vmatprep.mubr.bf16.mxu0 %v2610_v14  ;;  %v845_v41 = vsel %vm698_vm2, %v3862_v3, %v679_v18  ;;  %v953_v18 = vld [vmem:[%s3774_s2] sm:$0x3] }
  0xfb   : > { %v689_v38 = vpop.permute.xlu1 %688 }
  0xfc   : > { %1522 = vmatmul.mubr.bf16.gmra.mrb[52].mxu1 %v739_v57  ;;  %v865_v36 = vsel %vm698_vm2, %v3867_v56, %v689_v38 }
  0xfd   : > { %1531 = vmatprep.mubr.bf16.mxu1 %v805_v54 }
  0xff   : > { %2177 = vmatmul.mubr.msk.bf16.gmra.mrb[20].mxu0 %vm698_vm2, %v3851_v22  ;;  %v691_v23 = vpop.permute.xlu1 %690 }
 0x100   : > { %1837 = vmatprep.mubr.bf16.mxu0 %v2610_v14 }
 0x103   : > { %v693_v16 = vpop.permute.xlu1 %692 }
 0x104   : > { %1532 = vmatmul.mubr.bf16.gmra.mrb[56].mxu1 %v742_v43  ;;  %v873_v6 = vsel %vm698_vm2, %v3321_v63, %v693_v16 }
 0x105   : > { %1541 = vmatprep.mubr.bf16.mxu1 %v809_v12 }
 0x107   : > { %2178 = vmatmul.mubr.msk.bf16.gmra.mrb[24].mxu0 %vm698_vm2, %v3857_v46 }
 0x108   : > { %1847 = vmatprep.mubr.bf16.mxu0 %v2610_v14 }
 0x10c   : > { %1542 = vmatmul.mubr.bf16.gmra.mrb[60].mxu1 %v745_v0 }
 0x10d   : > { %1664 = vmatprep.mubr.bf16.mxu1 %v730_v5 }
 0x10f   : > { %2179 = vmatmul.mubr.msk.bf16.gmra.mrb[28].mxu0 %vm698_vm2, %v3271_v4  ;;  %v3864_v4 = vld [vmem:[#allocation27_spill] sm:$0xff] }
 0x110   : > { %1857 = vmatprep.mubr.bf16.mxu0 %v2610_v14  ;;  %v853_v22 = vsel %vm698_vm2, %v3864_v4, %v683_v52 }
 0x114   : > { %1665 = vmatmul.mubr.bf16.vlgmr.msra.gmra.mrb[32].mxu1 %v845_v41 }
 0x115   : > { %1674 = vmatprep.mubr.bf16.mxu1 %v733_v50 }
 0x117   : > { %2180 = vmatmul.mubr.msk.bf16.gmra.mrb[32].mxu0 %vm698_vm2, %v3282_v39  ;;  %v3865_v39 = vld [vmem:[#allocation28_spill] sm:$0xff] }
 0x118   : > { %1867 = vmatprep.mubr.bf16.mxu0 %v2610_v14  ;;  %v857_v24 = vsel %vm698_vm2, %v3865_v39, %v685_v17 }
 0x11c   : > { %1675 = vmatmul.mubr.bf16.gmra.mrb[36].mxu1 %v849_v7 }
 0x11d   : > { %1684 = vmatprep.mubr.bf16.mxu1 %v736_v19 }
 0x11f   : > { %2181 = vmatmul.mubr.msk.bf16.gmra.mrb[36].mxu0 %vm698_vm2, %v3292_v30  ;;  %v3866_v30 = vld [vmem:[#allocation29_spill] sm:$0xff] }
 0x120   : > { %1877 = vmatprep.mubr.bf16.mxu0 %v2610_v14  ;;  %v861_v27 = vsel %vm698_vm2, %v3866_v30, %v687_v2 }
 0x124   : > { %1685 = vmatmul.mubr.bf16.gmra.mrb[40].mxu1 %v853_v22 }
 0x125   : > { %1694 = vmatprep.mubr.bf16.mxu1 %v739_v57  ;;  %v955_v57 = vlaneseq }
 0x127   : > { %2182 = vmatmul.mubr.msk.bf16.gmra.mrb[40].mxu0 %vm698_vm2, %v3300_v45  ;;  %v695_v45 = vpop.permute.xlu0 %694  ;;  %v956_v10 = vshrl.u32 %v955_v57, 7 }
 0x128   : > { %1887 = vmatprep.mubr.bf16.mxu0 %v2610_v14 }
 0x129   : > { %v957_v48 = vsub.s32 0, %v956_v10  ;;  %v961_v3 = vsub.s32 1, %v956_v10 }
 0x12b   : > { %v697_v44 = vpop.permute.xlu0 %696  ;;  %v3601_v8 = vrot.slane %v953_v18, %v957_v48  ;;  %v3603_v49 = vrot.slane %v953_v18, %v961_v3 }
 0x12c   : > { %1695 = vmatmul.mubr.bf16.gmra.mrb[44].mxu1 %v857_v24  ;;  %v879_v46 = vsel %vm698_vm2, %v3276_v11, %v697_v44 }
 0x12d   : > { %1704 = vmatprep.mubr.bf16.mxu1 %v742_v43 }
 0x12f   : > { %2183 = vmatmul.mubr.msk.bf16.gmra.mrb[44].mxu0 %vm698_vm2, %v3305_v51  ;;  %v876_v51 = vsel %vm698_vm2, %v3256_v33, %v695_v45  ;;  %v595_v33 = vrot.slane %v3276_v11, 1 }
 0x130   : > { %1897 = vmatprep.mubr.bf16.mxu0 %v2610_v14 }
 0x134   : > { %1705 = vmatmul.mubr.bf16.gmra.mrb[48].mxu1 %v861_v27 }
 0x135   : > { %1714 = vmatprep.mubr.bf16.mxu1 %v745_v0 }
 0x137   : > { %2184 = vmatmul.mubr.msk.bf16.gmra.mrb[48].mxu0 %vm698_vm2, %v3316_v53  ;;  %v869_v53 = vsel %vm698_vm2, %v3868_v55, %v691_v23 }
 0x138   : > { %1907 = vmatprep.mubr.bf16.mxu0 %v2610_v14 }
 0x13c   : > { %1715 = vmatmul.mubr.bf16.gmra.mrb[52].mxu1 %v865_v36 }
 0x13d   : > { %1724 = vmatprep.mubr.bf16.mxu1 %v876_v51 }
 0x13f   : > { %2185 = vmatmul.mubr.msk.bf16.gmra.mrb[52].mxu0 %vm698_vm2, %v3328_v42  ;;  %v596_v42 = vrot.slane %v3294_v32, 1 }
 0x140   : > { %1917 = vmatprep.mubr.bf16.mxu0 %v2610_v14 }
 0x141   : > { %v597_v58 = vsel %vm515_vm1, %v595_v33, %v596_v42 }
 0x144   : > { %1725 = vmatmul.mubr.bf16.gmra.mrb[56].mxu1 %v869_v53 }
 0x145   : > { %1734 = vmatprep.mubr.bf16.mxu1 %v879_v46 }
 0x147   : > { %2186 = vmatmul.mubr.msk.bf16.gmra.mrb[56].mxu0 %vm698_vm2, %v3336_v31 }
 0x148   : > { %1927 = vmatprep.mubr.bf16.mxu0 %v2610_v14 }
 0x14c   : > { %1735 = vmatmul.mubr.bf16.gmra.mrb[60].mxu1 %v873_v6 }
 0x14f   : > { %2187 = vmatmul.mubr.msk.bf16.gmra.mrb[60].mxu0 %vm698_vm2, %v597_v58 }
 0x167   : > { %v1393_v1 = vpop.f32.mrb[0].mxu1 }
 0x168   : > { %v1395_v62 = vpop.f32.mrb[1].mxu1  ;;  %v1394_v7 = vadd.f32 %v1393_v1, %v3601_v8 }
 0x169   : > { %v1397_v21 = vpop.f32.mrb[2].mxu1  ;;  %v1396_v52 = vadd.f32 %v1395_v62, %v3603_v49 }
 0x16a   : > { %v1399_v47 = vpop.f32.mrb[3].mxu1  ;;  %v1398_v22 = vadd.f32 %v1397_v21, %v3601_v8 }
 0x16b   : > { %v1400_v24 = vadd.f32 %v1399_v47, %v3603_v49 }
 0x16f   : > { %v1403_v26 = vpop.f32.mrb[4].mxu1 }
 0x170   : > { %v1405_v31 = vpop.f32.mrb[5].mxu1  ;;  %v1404_v56 = vadd.f32 %v1403_v26, %v3601_v8 }
 0x171   : > { %v1407_v34 = vpop.f32.mrb[6].mxu1  ;;  %v1406_v36 = vadd.f32 %v1405_v31, %v3603_v49 }
 0x172   : > { %v1409_v14 = vpop.f32.mrb[7].mxu1  ;;  %v1408_v23 = vadd.f32 %v1407_v34, %v3601_v8 }
 0x173   : > { %v1410_v53 = vadd.f32 %v1409_v14, %v3603_v49 }
 0x177   : > { %v3550_v28 = vpop.f32.mrb[8].mxu1 }
 0x178   : > { %v3552_v11 = vpop.f32.mrb[9].mxu1  ;;  %v1414_v58 = vadd.f32 %v3550_v28, %v3601_v8 }
 0x179   : > { %v3554_v32 = vpop.f32.mrb[10].mxu1  ;;  %v1416_v1 = vadd.f32 %v3552_v11, %v3603_v49 }
 0x17a   : > { %v3556_v63 = vpop.f32.mrb[11].mxu1  ;;  %v1418_v21 = vadd.f32 %v3554_v32, %v3601_v8 }
 0x17b   : > { %v1420_v31 = vadd.f32 %v3556_v63, %v3603_v49 }
 0x17f   : > { %v3558_v37 = vpop.f32.mrb[12].mxu1 }
 0x180   : > { %v3560_v13 = vpop.f32.mrb[13].mxu1  ;;  %v1424_v11 = vadd.f32 %v3558_v37, %v3601_v8 }
 0x181   : > { %v3562_v5 = vpop.f32.mrb[14].mxu1  ;;  %v1426_v32 = vadd.f32 %v3560_v13, %v3603_v49 }
 0x182   : > { %v3564_v29 = vpop.f32.mrb[15].mxu1  ;;  %v1428_v48 = vadd.f32 %v3562_v5, %v3601_v8 }
 0x187   : > { %v3566_v40 = vpop.f32.mrb[16].mxu1 }
 0x188   : > { %v3568_v35 = vpop.f32.mrb[17].mxu1  ;;  %v1434_v13 = vadd.f32 %v3566_v40, %v3601_v8 }
 0x189   : > { %v3570_v50 = vpop.f32.mrb[18].mxu1  ;;  %v1436_v5 = vadd.f32 %v3568_v35, %v3603_v49 }
 0x18a   : > { %v3572_v15 = vpop.f32.mrb[19].mxu1 }
 0x18f   : > { %v3574_v25 = vpop.f32.mrb[20].mxu1 }
 0x190   : > { %v3576_v9 = vpop.f32.mrb[21].mxu1  ;;  %v1444_v35 = vadd.f32 %v3574_v25, %v3601_v8 }
 0x191   : > { %v3578_v19 = vpop.f32.mrb[22].mxu1 }
 0x192   : > { %v3580_v20 = vpop.f32.mrb[23].mxu1 }
 0x197   : > { %v3582_v59 = vpop.f32.mrb[24].mxu1 }
 0x198   : > { %v3584_v60 = vpop.f32.mrb[25].mxu1 }
 0x199   : > { %v3586_v54 = vpop.f32.mrb[26].mxu1 }
 0x19a   : > { %v3588_v61 = vpop.f32.mrb[27].mxu1 }
 0x19f   : > { %v3590_v43 = vpop.f32.mrb[28].mxu1 }
 0x1a0   : > { %v3592_v12 = vpop.f32.mrb[29].mxu1 }
 0x1a1   : > { %v3594_v0 = vpop.f32.mrb[30].mxu1 }
 0x1a2   : > { %v3599_v41 = vpop.f32.mrb[31].mxu1 }
 0x1aa   : > { %v1779_v4 = vpop.f32.mrb[0].mxu0 }
 0x1ab   : > { %v2256_v17 = vadd.f32 %v1779_v4, %v1394_v7  ;;  %v1781_v39 = vpop.f32.mrb[1].mxu0  ;;  %v1430_v7 = vadd.f32 %v3564_v29, %v3603_v49 }
 0x1ac   : > { %v2258_v2 = vadd.f32 %v1781_v39, %v1396_v52  ;;  %v1783_v30 = vpop.f32.mrb[2].mxu0  ;;  %v1438_v39 = vadd.f32 %v3570_v50, %v3601_v8  ;;  %v1446_v50 = vadd.f32 %v3576_v9, %v3603_v49  ;;  %v1454_v9 = vadd.f32 %v3582_v59, %v3601_v8 }
 0x1ad   : > { %1938 = vst [vmem:[%s3611_s23] sm:$0xff] %v2256_v17  ;;  %v2260_v27 = vadd.f32 %v1783_v30, %v1398_v22  ;;  %v1785_v38 = vpop.f32.mrb[3].mxu0  ;;  %v1440_v30 = vadd.f32 %v3572_v15, %v3603_v49 }
 0x1ae   : > { %2188 = vst [vmem:[%s3611_s23 + $0x10] sm:$0xff] %v2258_v2  ;;  %v2262_v45 = vadd.f32 %v1785_v38, %v1400_v24 }
 0x1af   : > { %1939 = vst [vmem:[%s3611_s23 + $0x8] sm:$0xff] %v2260_v27 }
 0x1b0   : > { %2189 = vst [vmem:[%s3611_s23 + $0x18] sm:$0xff] %v2262_v45 }
 0x1b2   : > { %v1789_v51 = vpop.f32.mrb[4].mxu0 }
 0x1b3   : > { %v2264_v44 = vadd.f32 %v1789_v51, %v1404_v56  ;;  %v1791_v55 = vpop.f32.mrb[5].mxu0 }
 0x1b4   : > { %v2266_v46 = vadd.f32 %v1791_v55, %v1406_v36  ;;  %v1793_v16 = vpop.f32.mrb[6].mxu0  ;;  %v1448_v36 = vadd.f32 %v3578_v19, %v3601_v8  ;;  %v1456_v19 = vadd.f32 %v3584_v60, %v3603_v49  ;;  %v1464_v60 = vadd.f32 %v3590_v43, %v3601_v8 }
 0x1b5   : > { %1940 = vst [vmem:[%s3611_s23 + $0x20] sm:$0xff] %v2264_v44  ;;  %v2268_v33 = vadd.f32 %v1793_v16, %v1408_v23  ;;  %v1795_v42 = vpop.f32.mrb[7].mxu0  ;;  %v1450_v44 = vadd.f32 %v3580_v20, %v3603_v49 }
 0x1b6   : > { %2190 = vst [vmem:[%s3611_s23 + $0x30] sm:$0xff] %v2266_v46  ;;  %v2270_v6 = vadd.f32 %v1795_v42, %v1410_v53 }
 0x1b7   : > { %1941 = vst [vmem:[%s3611_s23 + $0x28] sm:$0xff] %v2268_v33  ;;  %v1458_v33 = vadd.f32 %v3586_v54, %v3601_v8  ;;  %v1466_v54 = vadd.f32 %v3592_v12, %v3603_v49 }
 0x1b8   : > { %2191 = vst [vmem:[%s3611_s23 + $0x38] sm:$0xff] %v2270_v6 }
 0x1ba   : > { %v1799_v62 = vpop.f32.mrb[8].mxu0 }
 0x1bb   : > { %v2272_v47 = vadd.f32 %v1799_v62, %v1414_v58  ;;  %v1801_v26 = vpop.f32.mrb[9].mxu0  ;;  %v1460_v58 = vadd.f32 %v3588_v61, %v3603_v49 }
 0x1bc   : > { %v2274_v34 = vadd.f32 %v1801_v26, %v1416_v1  ;;  %v1803_v14 = vpop.f32.mrb[10].mxu0  ;;  %v1468_v26 = vadd.f32 %v3594_v0, %v3601_v8 }
 0x1bd   : > { %1942 = vst [vmem:[%s3611_s23 + $0x40] sm:$0xff] %v2272_v47  ;;  %v2276_v57 = vadd.f32 %v1803_v14, %v1418_v21  ;;  %v1805_v10 = vpop.f32.mrb[11].mxu0  ;;  %v1470_v14 = vadd.f32 %v3599_v41, %v3603_v49 }
 0x1be   : > { %2192 = vst [vmem:[%s3611_s23 + $0x50] sm:$0xff] %v2274_v34  ;;  %v2278_v28 = vadd.f32 %v1805_v10, %v1420_v31 }
 0x1bf   : > { %1943 = vst [vmem:[%s3611_s23 + $0x48] sm:$0xff] %v2276_v57 }
 0x1c0   : > { %2193 = vst [vmem:[%s3611_s23 + $0x58] sm:$0xff] %v2278_v28 }
 0x1c2   : > { %v1809_v63 = vpop.f32.mrb[12].mxu0 }
 0x1c3   : > { %v2280_v18 = vadd.f32 %v1809_v63, %v1424_v11  ;;  %v1811_v3 = vpop.f32.mrb[13].mxu0 }
 0x1c4   : > { %v2282_v52 = vadd.f32 %v1811_v3, %v1426_v32  ;;  %v1813_v4 = vpop.f32.mrb[14].mxu0 }
 0x1c5   : > { %1944 = vst [vmem:[%s3611_s23 + $0x60] sm:$0xff] %v2280_v18  ;;  %v2284_v22 = vadd.f32 %v1813_v4, %v1428_v48  ;;  %v1815_v17 = vpop.f32.mrb[15].mxu0 }
 0x1c6   : > { %2194 = vst [vmem:[%s3611_s23 + $0x70] sm:$0xff] %v2282_v52  ;;  %v2286_v37 = vadd.f32 %v1815_v17, %v1430_v7 }
 0x1c7   : > { %1945 = vst [vmem:[%s3611_s23 + $0x68] sm:$0xff] %v2284_v22 }
 0x1c8   : > { %2195 = vst [vmem:[%s3611_s23 + $0x78] sm:$0xff] %v2286_v37 }
 0x1ca   : > { %v1819_v29 = vpop.f32.mrb[16].mxu0 }
 0x1cb   : > { %v2288_v24 = vadd.f32 %v1819_v29, %v1434_v13  ;;  %v1821_v2 = vpop.f32.mrb[17].mxu0 }
 0x1cc   : > { %v2290_v27 = vadd.f32 %v1821_v2, %v1436_v5  ;;  %v1823_v38 = vpop.f32.mrb[18].mxu0 }
 0x1cd   : > { %1946 = vst [vmem:[%s3611_s23 + $0x80] sm:$0xff] %v2288_v24  ;;  %v2292_v45 = vadd.f32 %v1823_v38, %v1438_v39  ;;  %v1825_v56 = vpop.f32.mrb[19].mxu0 }
 0x1ce   : > { %2196 = vst [vmem:[%s3611_s23 + $0x90] sm:$0xff] %v2290_v27  ;;  %v2294_v40 = vadd.f32 %v1825_v56, %v1440_v30 }
 0x1cf   : > { %1947 = vst [vmem:[%s3611_s23 + $0x88] sm:$0xff] %v2292_v45 }
 0x1d0   : > { %2197 = vst [vmem:[%s3611_s23 + $0x98] sm:$0xff] %v2294_v40 }
 0x1d2   : > { %v1829_v15 = vpop.f32.mrb[20].mxu0 }
 0x1d3   : > { %v2296_v51 = vadd.f32 %v1829_v15, %v1444_v35  ;;  %v1831_v23 = vpop.f32.mrb[21].mxu0 }
 0x1d4   : > { %v2298_v55 = vadd.f32 %v1831_v23, %v1446_v50  ;;  %v1833_v53 = vpop.f32.mrb[22].mxu0 }
 0x1d5   : > { %1948 = vst [vmem:[%s3611_s23 + $0xa0] sm:$0xff] %v2296_v51  ;;  %v2300_v46 = vadd.f32 %v1833_v53, %v1448_v36  ;;  %v1835_v16 = vpop.f32.mrb[23].mxu0 }
 0x1d6   : > { %2198 = vst [vmem:[%s3611_s23 + $0xb0] sm:$0xff] %v2298_v55  ;;  %v2302_v25 = vadd.f32 %v1835_v16, %v1450_v44 }
 0x1d7   : > { %1949 = vst [vmem:[%s3611_s23 + $0xa8] sm:$0xff] %v2300_v46 }
 0x1d8   : > { %2199 = vst [vmem:[%s3611_s23 + $0xb8] sm:$0xff] %v2302_v25 }
 0x1da   : > { %v1839_v20 = vpop.f32.mrb[24].mxu0 }
 0x1db   : > { %v2304_v42 = vadd.f32 %v1839_v20, %v1454_v9  ;;  %v1841_v6 = vpop.f32.mrb[25].mxu0 }
 0x1dc   : > { %v2306_v1 = vadd.f32 %v1841_v6, %v1456_v19  ;;  %v1843_v62 = vpop.f32.mrb[26].mxu0 }
 0x1dd   : > { %1950 = vst [vmem:[%s3611_s23 + $0xc0] sm:$0xff] %v2304_v42  ;;  %v2308_v21 = vadd.f32 %v1843_v62, %v1458_v33  ;;  %v1845_v47 = vpop.f32.mrb[27].mxu0 }
 0x1de   : > { %2200 = vst [vmem:[%s3611_s23 + $0xd0] sm:$0xff] %v2306_v1  ;;  %v2310_v59 = vadd.f32 %v1845_v47, %v1460_v58 }
 0x1df   : > { %1951 = vst [vmem:[%s3611_s23 + $0xc8] sm:$0xff] %v2308_v21 }
 0x1e0   : > { %2201 = vst [vmem:[%s3611_s23 + $0xd8] sm:$0xff] %v2310_v59 }
 0x1e2   : > { %v1849_v61 = vpop.f32.mrb[28].mxu0 }
 0x1e3   : > { %v2312_v31 = vadd.f32 %v1849_v61, %v1464_v60  ;;  %v1851_v34 = vpop.f32.mrb[29].mxu0 }
 0x1e4   : > { %v2314_v57 = vadd.f32 %v1851_v34, %v1466_v54  ;;  %v1853_v10 = vpop.f32.mrb[30].mxu0 }
 0x1e5   : > { %1952 = vst [vmem:[%s3611_s23 + $0xe0] sm:$0xff] %v2312_v31  ;;  %v2316_v28 = vadd.f32 %v1853_v10, %v1468_v26  ;;  %v1855_v11 = vpop.f32.mrb[31].mxu0 }
 0x1e6   : > { %2202 = vst [vmem:[%s3611_s23 + $0xf0] sm:$0xff] %v2314_v57  ;;  %v2318_v43 = vadd.f32 %v1855_v11, %v1470_v14 }
 0x1e7   : > { %1953 = vst [vmem:[%s3611_s23 + $0xe8] sm:$0xff] %v2316_v28  ;;  %v1666_v32 = vpop.f32.mrb[32].mxu1 }
 0x1e8   : > { %2203 = vst [vmem:[%s3611_s23 + $0xf8] sm:$0xff] %v2318_v43  ;;  %v1668_v12 = vpop.f32.mrb[33].mxu1  ;;  %v2319_v0 = vadd.f32 %v1666_v32, %v3601_v8 }
 0x1e9   : > { %v1670_v63 = vpop.f32.mrb[34].mxu1  ;;  %v2321_v48 = vadd.f32 %v1668_v12, %v3603_v49 }
 0x1ea   : > { %v1672_v41 = vpop.f32.mrb[35].mxu1  ;;  %v1859_v18 = vpop.f32.mrb[32].mxu0  ;;  %v2323_v3 = vadd.f32 %v1670_v63, %v3601_v8 }
 0x1eb   : > { %v2320_v7 = vadd.f32 %v2319_v0, %v1859_v18  ;;  %v1861_v52 = vpop.f32.mrb[33].mxu0  ;;  %v2325_v4 = vadd.f32 %v1672_v41, %v3603_v49 }
 0x1ec   : > { %v2322_v22 = vadd.f32 %v2321_v48, %v1861_v52  ;;  %v1863_v17 = vpop.f32.mrb[34].mxu0 }
 0x1ed   : > { %1954 = vst [vmem:[%s3611_s23 + $0x100] sm:$0xff] %v2320_v7  ;;  %v2324_v37 = vadd.f32 %v2323_v3, %v1863_v17  ;;  %v1865_v13 = vpop.f32.mrb[35].mxu0 }
 0x1ee   : > { %2204 = vst [vmem:[%s3611_s23 + $0x110] sm:$0xff] %v2322_v22  ;;  %v2326_v5 = vadd.f32 %v2325_v4, %v1865_v13 }
 0x1ef   : > { %1955 = vst [vmem:[%s3611_s23 + $0x108] sm:$0xff] %v2324_v37  ;;  %v1676_v29 = vpop.f32.mrb[36].mxu1 }
 0x1f0   : > { %2205 = vst [vmem:[%s3611_s23 + $0x118] sm:$0xff] %v2326_v5  ;;  %v1678_v39 = vpop.f32.mrb[37].mxu1  ;;  %v2327_v24 = vadd.f32 %v1676_v29, %v3601_v8 }
 0x1f1   : > { %v1680_v2 = vpop.f32.mrb[38].mxu1  ;;  %v2329_v30 = vadd.f32 %v1678_v39, %v3603_v49 }
 0x1f2   : > { %v1682_v27 = vpop.f32.mrb[39].mxu1  ;;  %v1869_v38 = vpop.f32.mrb[36].mxu0  ;;  %v2331_v45 = vadd.f32 %v1680_v2, %v3601_v8 }
 0x1f3   : > { %v2328_v56 = vadd.f32 %v2327_v24, %v1869_v38  ;;  %v1871_v40 = vpop.f32.mrb[37].mxu0  ;;  %v2333_v35 = vadd.f32 %v1682_v27, %v3603_v49 }
 0x1f4   : > { %v2330_v50 = vadd.f32 %v2329_v30, %v1871_v40  ;;  %v1873_v15 = vpop.f32.mrb[38].mxu0 }
 0x1f5   : > { %1956 = vst [vmem:[%s3611_s23 + $0x120] sm:$0xff] %v2328_v56  ;;  %v2332_v36 = vadd.f32 %v2331_v45, %v1873_v15  ;;  %v1875_v51 = vpop.f32.mrb[39].mxu0 }
 0x1f6   : > { %2206 = vst [vmem:[%s3611_s23 + $0x130] sm:$0xff] %v2330_v50  ;;  %v2334_v23 = vadd.f32 %v2333_v35, %v1875_v51 }
 0x1f7   : > { %1957 = vst [vmem:[%s3611_s23 + $0x128] sm:$0xff] %v2332_v36  ;;  %v1686_v44 = vpop.f32.mrb[40].mxu1 }
 0x1f8   : > { %2207 = vst [vmem:[%s3611_s23 + $0x138] sm:$0xff] %v2334_v23  ;;  %v1688_v55 = vpop.f32.mrb[41].mxu1  ;;  %v2335_v53 = vadd.f32 %v1686_v44, %v3601_v8 }
 0x1f9   : > { %v1690_v46 = vpop.f32.mrb[42].mxu1  ;;  %v2337_v16 = vadd.f32 %v1688_v55, %v3603_v49 }
 0x1fa   : > { %v1692_v25 = vpop.f32.mrb[43].mxu1  ;;  %v1879_v9 = vpop.f32.mrb[40].mxu0  ;;  %v2339_v19 = vadd.f32 %v1690_v46, %v3601_v8 }
 0x1fb   : > { %v2336_v20 = vadd.f32 %v2335_v53, %v1879_v9  ;;  %v1881_v33 = vpop.f32.mrb[41].mxu0  ;;  %v2341_v42 = vadd.f32 %v1692_v25, %v3603_v49 }
 0x1fc   : > { %v2338_v6 = vadd.f32 %v2337_v16, %v1881_v33  ;;  %v1883_v58 = vpop.f32.mrb[42].mxu0 }
 0x1fd   : > { %1958 = vst [vmem:[%s3611_s23 + $0x140] sm:$0xff] %v2336_v20  ;;  %v2340_v1 = vadd.f32 %v2339_v19, %v1883_v58  ;;  %v1885_v62 = vpop.f32.mrb[43].mxu0 }
 0x1fe   : > { %2208 = vst [vmem:[%s3611_s23 + $0x150] sm:$0xff] %v2338_v6  ;;  %v2342_v21 = vadd.f32 %v2341_v42, %v1885_v62 }
 0x1ff   : > { %1959 = vst [vmem:[%s3611_s23 + $0x148] sm:$0xff] %v2340_v1  ;;  %v1696_v47 = vpop.f32.mrb[44].mxu1 }
 0x200   : > { %2209 = vst [vmem:[%s3611_s23 + $0x158] sm:$0xff] %v2342_v21  ;;  %v1698_v59 = vpop.f32.mrb[45].mxu1  ;;  %v2343_v60 = vadd.f32 %v1696_v47, %v3601_v8 }
 0x201   : > { %v1700_v54 = vpop.f32.mrb[46].mxu1  ;;  %v2345_v61 = vadd.f32 %v1698_v59, %v3603_v49 }
 0x202   : > { %v1702_v26 = vpop.f32.mrb[47].mxu1  ;;  %v1889_v31 = vpop.f32.mrb[44].mxu0  ;;  %v2347_v34 = vadd.f32 %v1700_v54, %v3601_v8 }
 0x203   : > { %v2344_v14 = vadd.f32 %v2343_v60, %v1889_v31  ;;  %v1891_v57 = vpop.f32.mrb[45].mxu0  ;;  %v2349_v10 = vadd.f32 %v1702_v26, %v3603_v49 }
 0x204   : > { %v2346_v28 = vadd.f32 %v2345_v61, %v1891_v57  ;;  %v1893_v11 = vpop.f32.mrb[46].mxu0 }
 0x205   : > { %1960 = vst [vmem:[%s3611_s23 + $0x160] sm:$0xff] %v2344_v14  ;;  %v2348_v43 = vadd.f32 %v2347_v34, %v1893_v11  ;;  %v1895_v32 = vpop.f32.mrb[47].mxu0 }
 0x206   : > { %2210 = vst [vmem:[%s3611_s23 + $0x170] sm:$0xff] %v2346_v28  ;;  %v2350_v12 = vadd.f32 %v2349_v10, %v1895_v32 }
 0x207   : > { %1961 = vst [vmem:[%s3611_s23 + $0x168] sm:$0xff] %v2348_v43  ;;  %v1706_v0 = vpop.f32.mrb[48].mxu1 }
 0x208   : > { %2211 = vst [vmem:[%s3611_s23 + $0x178] sm:$0xff] %v2350_v12  ;;  %v1708_v63 = vpop.f32.mrb[49].mxu1  ;;  %v2351_v48 = vadd.f32 %v1706_v0, %v3601_v8 }
 0x209   : > { %v1710_v41 = vpop.f32.mrb[50].mxu1  ;;  %v2353_v18 = vadd.f32 %v1708_v63, %v3603_v49 }
 0x20a   : > { %v1712_v3 = vpop.f32.mrb[51].mxu1  ;;  %v1899_v7 = vpop.f32.mrb[48].mxu0  ;;  %v2355_v52 = vadd.f32 %v1710_v41, %v3601_v8 }
 0x20b   : > { %v2352_v4 = vadd.f32 %v2351_v48, %v1899_v7  ;;  %v1901_v22 = vpop.f32.mrb[49].mxu0  ;;  %v2357_v17 = vadd.f32 %v1712_v3, %v3603_v49 }
 0x20c   : > { %v2354_v37 = vadd.f32 %v2353_v18, %v1901_v22  ;;  %v1903_v13 = vpop.f32.mrb[50].mxu0 }
 0x20d   : > { %1962 = vst [vmem:[%s3611_s23 + $0x180] sm:$0xff] %v2352_v4  ;;  %v2356_v5 = vadd.f32 %v2355_v52, %v1903_v13  ;;  %v1905_v29 = vpop.f32.mrb[51].mxu0 }
 0x20e   : > { %2212 = vst [vmem:[%s3611_s23 + $0x190] sm:$0xff] %v2354_v37  ;;  %v2358_v39 = vadd.f32 %v2357_v17, %v1905_v29 }
 0x20f   : > { %1963 = vst [vmem:[%s3611_s23 + $0x188] sm:$0xff] %v2356_v5  ;;  %v1716_v24 = vpop.f32.mrb[52].mxu1 }
 0x210   : > { %2213 = vst [vmem:[%s3611_s23 + $0x198] sm:$0xff] %v2358_v39  ;;  %v1718_v2 = vpop.f32.mrb[53].mxu1  ;;  %v2359_v30 = vadd.f32 %v1716_v24, %v3601_v8 }
 0x211   : > { %v1720_v27 = vpop.f32.mrb[54].mxu1  ;;  %v2361_v38 = vadd.f32 %v1718_v2, %v3603_v49 }
 0x212   : > { %v1722_v45 = vpop.f32.mrb[55].mxu1  ;;  %v1909_v56 = vpop.f32.mrb[52].mxu0  ;;  %v2363_v40 = vadd.f32 %v1720_v27, %v3601_v8 }
 0x213   : > { %v2360_v35 = vadd.f32 %v2359_v30, %v1909_v56  ;;  %v1911_v50 = vpop.f32.mrb[53].mxu0  ;;  %v2365_v15 = vadd.f32 %v1722_v45, %v3603_v49 }
 0x214   : > { %v2362_v36 = vadd.f32 %v2361_v38, %v1911_v50  ;;  %v1913_v51 = vpop.f32.mrb[54].mxu0 }
 0x215   : > { %1964 = vst [vmem:[%s3611_s23 + $0x1a0] sm:$0xff] %v2360_v35  ;;  %v2364_v23 = vadd.f32 %v2363_v40, %v1913_v51  ;;  %v1915_v44 = vpop.f32.mrb[55].mxu0 }
 0x216   : > { %2214 = vst [vmem:[%s3611_s23 + $0x1b0] sm:$0xff] %v2362_v36  ;;  %v2366_v55 = vadd.f32 %v2365_v15, %v1915_v44 }
 0x217   : > { %1965 = vst [vmem:[%s3611_s23 + $0x1a8] sm:$0xff] %v2364_v23  ;;  %v1726_v53 = vpop.f32.mrb[56].mxu1 }
 0x218   : > { %2215 = vst [vmem:[%s3611_s23 + $0x1b8] sm:$0xff] %v2366_v55  ;;  %v1728_v46 = vpop.f32.mrb[57].mxu1  ;;  %v2367_v16 = vadd.f32 %v1726_v53, %v3601_v8 }
 0x219   : > { %v1730_v25 = vpop.f32.mrb[58].mxu1  ;;  %v2369_v9 = vadd.f32 %v1728_v46, %v3603_v49 }
 0x21a   : > { %v1732_v19 = vpop.f32.mrb[59].mxu1  ;;  %v1919_v20 = vpop.f32.mrb[56].mxu0  ;;  %v2371_v33 = vadd.f32 %v1730_v25, %v3601_v8 }
 0x21b   : > { %v2368_v42 = vadd.f32 %v2367_v16, %v1919_v20  ;;  %v1921_v6 = vpop.f32.mrb[57].mxu0  ;;  %v2373_v58 = vadd.f32 %v1732_v19, %v3603_v49 }
 0x21c   : > { %v2370_v1 = vadd.f32 %v2369_v9, %v1921_v6  ;;  %v1923_v62 = vpop.f32.mrb[58].mxu0 }
 0x21d   : > { %1966 = vst [vmem:[%s3611_s23 + $0x1c0] sm:$0xff] %v2368_v42  ;;  %v2372_v21 = vadd.f32 %v2371_v33, %v1923_v62  ;;  %v1925_v47 = vpop.f32.mrb[59].mxu0 }
 0x21e   : > { %2216 = vst [vmem:[%s3611_s23 + $0x1d0] sm:$0xff] %v2370_v1  ;;  %v2374_v59 = vadd.f32 %v2373_v58, %v1925_v47 }
 0x21f   : > { %1967 = vst [vmem:[%s3611_s23 + $0x1c8] sm:$0xff] %v2372_v21  ;;  %v1736_v60 = vpop.f32.mrb[60].mxu1 }
 0x220   : > { %2217 = vst [vmem:[%s3611_s23 + $0x1d8] sm:$0xff] %v2374_v59  ;;  %v1738_v54 = vpop.f32.mrb[61].mxu1  ;;  %v2375_v61 = vadd.f32 %v1736_v60, %v3601_v8 }
 0x221   : > { %v1740_v26 = vpop.f32.mrb[62].mxu1  ;;  %v2377_v31 = vadd.f32 %v1738_v54, %v3603_v49 }
 0x222   : > { %v1742_v34 = vpop.f32.mrb[63].mxu1  ;;  %v1929_v14 = vpop.f32.mrb[60].mxu0  ;;  %v2379_v57 = vadd.f32 %v1740_v26, %v3601_v8 }
 0x223   : > { %v2376_v10 = vadd.f32 %v2375_v61, %v1929_v14  ;;  %v1931_v28 = vpop.f32.mrb[61].mxu0  ;;  %v2381_v11 = vadd.f32 %v1742_v34, %v3603_v49 }
 0x224   : > { %v2378_v43 = vadd.f32 %v2377_v31, %v1931_v28  ;;  %v1933_v32 = vpop.f32.mrb[62].mxu0 }
 0x225   : > { %1968 = vst [vmem:[%s3611_s23 + $0x1e0] sm:$0xff] %v2376_v10  ;;  %v2380_v12 = vadd.f32 %v2379_v57, %v1933_v32  ;;  %v1935_v0 = vpop.f32.mrb[63].mxu0 }
 0x226   : > { %2218 = vst [vmem:[%s3611_s23 + $0x1f0] sm:$0xff] %v2378_v43  ;;  %v2382_v63 = vadd.f32 %v2381_v11, %v1935_v0 }
 0x227   : > { %1969 = vst [vmem:[%s3611_s23 + $0x1e8] sm:$0xff] %v2380_v12 }
 0x228   : > { %2219 = vst [vmem:[%s3611_s23 + $0x1f8] sm:$0xff] %v2382_v63 }
 0x229 PF: > { %s13_s14 = sadd.s32 1, %s2607_s14   ;;  %s3869_s12 = smov %s2603_s13 }
 0x22a   : > { %p10_p5 = scmp.ge.s32.totalorder %s13_s14, 4   ;;  %s3870_s13 = smov %s3872_s15 }
 0x22c   :  { %12 = sbr.rel (!%p10_p5) target bundleno = 2 (0x2), region = 64 }

</bundles_post_ra>
